<compile_context>
chip_gen: v5e
topology: v5e:2x2
jax: 0.10.0
libtpu: 0.0.40
codegen_flags: <defaults>
</compile_context>

<pallas_src>
import functools

import jax
import jax.numpy as jnp
from jax.experimental import pallas as pl
from jax.experimental.pallas import tpu as pltpu

IN_DIM = 107
HID = 256
CAT_DIM = 3 * 5     # 15
BER_DIM = 2 * 3     # 6
HEAD_DIM = 32       # fused head output width (cat | ber | zero pad)


def _round_up(n, m):
    return ((n + m - 1) // m) * m


def _tpu_defaults():
    """(tile_b, vmem_limit_bytes, bf16_act) tuned per TPU generation."""
    kind = ""
    try:
        dev = jax.devices()[0]
        if dev.platform == "tpu":
            kind = dev.device_kind.lower()
    except Exception:
        pass
    if "v5 lite" in kind or "v5e" in kind or "v5litepod" in kind:
        # v5e: MXU-bound at TB=1024 already; no bf16 VPU -> f32 epilogue.
        return 1024, 32 * 1024 * 1024, False
    if "v6" in kind or "trillium" in kind:
        # v6e: amortize the ~0.35us/step overhead; 128 MiB physical VMEM.
        return 4096, 96 * 1024 * 1024, True
    if "v7" in kind or "tpu7" in kind:
        # v7x: 64 MiB VMEM per TC -> cap the tile; 2 cores share the grid.
        return 2048, 48 * 1024 * 1024, True
    return 2048, 64 * 1024 * 1024, True


def _choose_tile_b(B, tile_b):
    """Sublane-legal batch tile: multiple of 8 (or == B), >=4 grid steps for
    large batches so megacore sharding / DMA pipelining have work to split."""
    if B <= 1024:
        return B                        # single step; block == full dim is legal
    tile_b = max(512, _round_up(tile_b, 8))
    want = max(512, _round_up(pl.cdiv(B, 4), 8))
    return min(tile_b, want)


def _element_kernel(x_ref,
                    w1_ref, b1_ref, w2_ref, b2_ref, w3_ref, b3_ref,
                    w4_ref, b4_ref, w5_ref, b5_ref,
                    wh_ref, bh_ref,
                    out_ref, *, bf16_act):
    # Five fused Linear+ReLU layers followed by one fused 32-wide linear head.
    def layer(h_bf16, w_ref, b_ref):
        acc = jnp.dot(h_bf16, w_ref[...], preferred_element_type=jnp.float32)
        if bf16_act:
            # v6e/v7x: packed bf16 bias-add + ReLU (halves the VALU cost).
            a = acc.astype(jnp.bfloat16) + b_ref[...].astype(jnp.bfloat16)
            return jnp.maximum(a, 0)
        # v5e: keep the f32 epilogue (no bf16 VPU), cast once for the next dot.
        return jnp.maximum(acc + b_ref[...], 0.0).astype(jnp.bfloat16)

    h = x_ref[...].astype(jnp.bfloat16)         # K=107, Mosaic pads/masks
    h = layer(h, w1_ref, b1_ref)
    h = layer(h, w2_ref, b2_ref)
    h = layer(h, w3_ref, b3_ref)
    h = layer(h, w4_ref, b4_ref)
    h = layer(h, w5_ref, b5_ref)
    z = jnp.dot(h, wh_ref[...], preferred_element_type=jnp.float32) + bh_ref[...]
    out_ref[...] = z.astype(out_ref.dtype)      # bf16 logits, 64 B/row


def element_model_forward(x, params, *, tile_b=None, vmem_limit_bytes=None,
                          bf16_act=None):
    """x: [B, 107] float32. Returns [cat_output (B,5,3), ber_output (B,3,2)]."""
    B = x.shape[0]
    d_tile, d_vmem, d_bf16 = _tpu_defaults()
    tile_b = d_tile if tile_b is None else tile_b
    vmem_limit_bytes = d_vmem if vmem_limit_bytes is None else vmem_limit_bytes
    bf16_act = d_bf16 if bf16_act is None else bf16_act

    TB = _choose_tile_b(B, tile_b)
    grid = (pl.cdiv(B, TB),)

    x_spec = pl.BlockSpec((TB, IN_DIM), lambda i: (i, 0))
    out_spec = pl.BlockSpec((TB, HEAD_DIM), lambda i: (i, 0))
    # Weights/biases: full-array blocks with a constant index_map -> fetched
    # once, VMEM-resident for every grid step (no re-DMA).
    param_specs = [pl.BlockSpec(p.shape, lambda i: (0, 0)) for p in params]

    flops = 2 * B * (IN_DIM * HID + 4 * HID * HID + HID * HEAD_DIM)
    bytes_accessed = (x.size * x.dtype.itemsize
                      + B * HEAD_DIM * 2
                      + sum(int(p.size) * p.dtype.itemsize for p in params))

    head_logits = pl.pallas_call(
        functools.partial(_element_kernel, bf16_act=bf16_act),
        out_shape=jax.ShapeDtypeStruct((B, HEAD_DIM), jnp.bfloat16),
        grid=grid,
        in_specs=[x_spec] + param_specs,
        out_specs=out_spec,
        compiler_params=pltpu.CompilerParams(
            dimension_semantics=("parallel",),
            vmem_limit_bytes=vmem_limit_bytes),
        cost_estimate=pl.CostEstimate(flops=flops, transcendentals=0,
                                      bytes_accessed=bytes_accessed),
    )(x, *params)

    # Tiny group softmaxes (over 3 / 2 elements) in f32 on the 32-column slab;
    # fused by the surrounding jit.
    logits = head_logits.astype(jnp.float32)
    cat_output = jax.nn.softmax(logits[:, :CAT_DIM].reshape(-1, 5, 3), axis=2)
    ber_output = jax.nn.softmax(
        logits[:, CAT_DIM:CAT_DIM + BER_DIM].reshape(-1, 3, 2), axis=2)
    return [cat_output, ber_output]


def element_model_reference(x, params, *, bf16_act):
    """Pure-JAX forward mirroring the kernel's arithmetic (for verification)."""
    (w1, b1, w2, b2, w3, b3, w4, b4, w5, b5, wh, bh) = params

    def layer(h, w, b):
        acc = jnp.dot(h, w, preferred_element_type=jnp.float32)
        if bf16_act:
            return jnp.maximum(acc.astype(jnp.bfloat16) + b.astype(jnp.bfloat16), 0)
        return jnp.maximum(acc + b, 0.0).astype(jnp.bfloat16)

    h = x.astype(jnp.bfloat16)
    for w, b in ((w1, b1), (w2, b2), (w3, b3), (w4, b4), (w5, b5)):
        h = layer(h, w, b)
    z = (jnp.dot(h, wh, preferred_element_type=jnp.float32) + bh).astype(jnp.bfloat16)
    logits = z.astype(jnp.float32)
    cat_output = jax.nn.softmax(logits[:, :CAT_DIM].reshape(-1, 5, 3), axis=2)
    ber_output = jax.nn.softmax(
        logits[:, CAT_DIM:CAT_DIM + BER_DIM].reshape(-1, 3, 2), axis=2)
    return [cat_output, ber_output]


def init_params(key):
    """Deterministic synthetic parameters matching _ElementModel shapes.

    Weights are stored as [in, out] (transposed vs. torch.nn.Linear) in bf16;
    biases are f32 [1, out]. The two heads are fused into one [256, 32]
    weight (cols 0:15 = cat, 15:21 = ber, 21:32 zero).
    """
    keys = jax.random.split(key, 14)

    def linear(kw, kb, fan_in, fan_out):
        bound = 1.0 / (fan_in ** 0.5)
        w = jax.random.uniform(kw, (fan_in, fan_out), jnp.float32, -bound, bound)
        b = jax.random.uniform(kb, (1, fan_out), jnp.float32, -bound, bound)
        return w, b

    w1, b1 = linear(keys[0], keys[1], IN_DIM, HID)
    w2, b2 = linear(keys[2], keys[3], HID, HID)
    w3, b3 = linear(keys[4], keys[5], HID, HID)
    w4, b4 = linear(keys[6], keys[7], HID, HID)
    w5, b5 = linear(keys[8], keys[9], HID, HID)
    wc, bc = linear(keys[10], keys[11], HID, CAT_DIM)
    wb, bb = linear(keys[12], keys[13], HID, BER_DIM)

    # Fuse the two heads into one 32-lane-padded matmul.
    wh = jnp.zeros((HID, HEAD_DIM), jnp.float32)
    wh = wh.at[:, :CAT_DIM].set(wc).at[:, CAT_DIM:CAT_DIM + BER_DIM].set(wb)
    bh = jnp.zeros((1, HEAD_DIM), jnp.float32)
    bh = bh.at[:, :CAT_DIM].set(bc).at[:, CAT_DIM:CAT_DIM + BER_DIM].set(bb)

    bf16 = lambda w: w.astype(jnp.bfloat16)
    return (bf16(w1), b1, bf16(w2), b2, bf16(w3), b3,
            bf16(w4), b4, bf16(w5), b5, bf16(wh), bh)


if __name__ == "__main__":
    key = jax.random.PRNGKey(0)
    pkey, xkey = jax.random.split(key)
    params = init_params(pkey)

    B = 8
    x = jax.random.normal(xkey, (B, IN_DIM), jnp.float32)

    _, _, bf16_act = _tpu_defaults()
    fwd = jax.jit(lambda xx: element_model_forward(xx, params))
    cat_output, ber_output = fwd(x)
    jax.block_until_ready(cat_output)
    jax.block_until_ready(ber_output)

    assert cat_output.shape == (B, 5, 3)
    assert ber_output.shape == (B, 3, 2)
    # softmax rows sum to 1 (softmax is computed in f32 outside the kernel)
    assert jnp.allclose(jnp.sum(cat_output, axis=2), 1.0, atol=1e-5)
    assert jnp.allclose(jnp.sum(ber_output, axis=2), 1.0, atol=1e-5)
    assert bool(jnp.all(jnp.isfinite(cat_output)))
    assert bool(jnp.all(jnp.isfinite(ber_output)))

    # Check against a pure-JAX reference with identical bf16 arithmetic.
    cat_ref, ber_ref = element_model_reference(x, params, bf16_act=bf16_act)
    assert jnp.allclose(cat_output, cat_ref, atol=2e-2), "cat mismatch vs reference"
    assert jnp.allclose(ber_output, ber_ref, atol=2e-2), "ber mismatch vs reference"

    print("KERNEL_OK")
</pallas_src>

<mosaic_0001>
module attributes {stable_mosaic.version = 11 : i64} {
  func.func @_element_kernel(%arg0: i32, %arg1: memref<8x107xf32, #tpu.memory_space<vmem>>, %arg2: memref<107x256xbf16, #tpu.memory_space<vmem>>, %arg3: memref<1x256xf32, #tpu.memory_space<vmem>>, %arg4: memref<256x256xbf16, #tpu.memory_space<vmem>>, %arg5: memref<1x256xf32, #tpu.memory_space<vmem>>, %arg6: memref<256x256xbf16, #tpu.memory_space<vmem>>, %arg7: memref<1x256xf32, #tpu.memory_space<vmem>>, %arg8: memref<256x256xbf16, #tpu.memory_space<vmem>>, %arg9: memref<1x256xf32, #tpu.memory_space<vmem>>, %arg10: memref<256x256xbf16, #tpu.memory_space<vmem>>, %arg11: memref<1x256xf32, #tpu.memory_space<vmem>>, %arg12: memref<256x32xbf16, #tpu.memory_space<vmem>>, %arg13: memref<1x32xf32, #tpu.memory_space<vmem>>, %arg14: memref<8x32xbf16, #tpu.memory_space<vmem>>) attributes {dimension_semantics = [#tpu.dimension_semantics<parallel>], iteration_bounds = array<i64: 1>, scalar_prefetch = 0 : i64, scratch_operands = 0 : i64, tpu.core_type = #tpu.core_type<tc>, window_params = [{transform_indices = @transform_0, window_bounds = array<i64: 8, 107>}, {pipeline_mode = #tpu.pipeline_mode<synchronous>, transform_indices = @transform_1, window_bounds = array<i64: 107, 256>}, {pipeline_mode = #tpu.pipeline_mode<synchronous>, transform_indices = @transform_2, window_bounds = array<i64: 1, 256>}, {pipeline_mode = #tpu.pipeline_mode<synchronous>, transform_indices = @transform_3, window_bounds = array<i64: 256, 256>}, {pipeline_mode = #tpu.pipeline_mode<synchronous>, transform_indices = @transform_4, window_bounds = array<i64: 1, 256>}, {pipeline_mode = #tpu.pipeline_mode<synchronous>, transform_indices = @transform_5, window_bounds = array<i64: 256, 256>}, {pipeline_mode = #tpu.pipeline_mode<synchronous>, transform_indices = @transform_6, window_bounds = array<i64: 1, 256>}, {pipeline_mode = #tpu.pipeline_mode<synchronous>, transform_indices = @transform_7, window_bounds = array<i64: 256, 256>}, {pipeline_mode = #tpu.pipeline_mode<synchronous>, transform_indices = @transform_8, window_bounds = array<i64: 1, 256>}, {pipeline_mode = #tpu.pipeline_mode<synchronous>, transform_indices = @transform_9, window_bounds = array<i64: 256, 256>}, {pipeline_mode = #tpu.pipeline_mode<synchronous>, transform_indices = @transform_10, window_bounds = array<i64: 1, 256>}, {pipeline_mode = #tpu.pipeline_mode<synchronous>, transform_indices = @transform_11, window_bounds = array<i64: 256, 32>}, {pipeline_mode = #tpu.pipeline_mode<synchronous>, transform_indices = @transform_12, window_bounds = array<i64: 1, 32>}, {transform_indices = @transform_13, window_bounds = array<i64: 8, 32>}]} {
    %c0 = arith.constant 0 : index
    %c0_0 = arith.constant 0 : index
    %0 = vector.load %arg1[%c0, %c0_0] : memref<8x107xf32, #tpu.memory_space<vmem>>, vector<8x107xf32>
    %1 = arith.truncf %0 : vector<8x107xf32> to vector<8x107xbf16>
    %c0_1 = arith.constant 0 : index
    %c0_2 = arith.constant 0 : index
    %2 = vector.load %arg2[%c0_1, %c0_2] : memref<107x256xbf16, #tpu.memory_space<vmem>>, vector<107x256xbf16>
    %cst = arith.constant dense<0.000000e+00> : vector<8x256xf32>
    %3 = tpu.matmul %1, %2, %cst {dimension_numbers = #tpu.dot_dimension_numbers<[1], [0], [0], [1], [0, 0, 1, 1], [], []>} : vector<8x107xbf16>, vector<107x256xbf16>, vector<8x256xf32> -> vector<8x256xf32>
    %4 = arith.truncf %3 : vector<8x256xf32> to vector<8x256xbf16>
    %c0_3 = arith.constant 0 : index
    %c0_4 = arith.constant 0 : index
    %5 = vector.load %arg3[%c0_3, %c0_4] : memref<1x256xf32, #tpu.memory_space<vmem>>, vector<1x256xf32>
    %6 = arith.truncf %5 : vector<1x256xf32> to vector<1x256xbf16>
    %7 = vector.broadcast %6 : vector<1x256xbf16> to vector<8x256xbf16>
    %8 = arith.addf %4, %7 : vector<8x256xbf16>
    %cst_5 = arith.constant 0.000000e+00 : bf16
    %9 = vector.broadcast %cst_5 : bf16 to vector<8x256xbf16>
    %10 = arith.maximumf %8, %9 : vector<8x256xbf16>
    %c0_6 = arith.constant 0 : index
    %c0_7 = arith.constant 0 : index
    %11 = vector.load %arg4[%c0_6, %c0_7] : memref<256x256xbf16, #tpu.memory_space<vmem>>, vector<256x256xbf16>
    %cst_8 = arith.constant dense<0.000000e+00> : vector<8x256xf32>
    %12 = tpu.matmul %10, %11, %cst_8 {dimension_numbers = #tpu.dot_dimension_numbers<[1], [0], [0], [1], [0, 0, 1, 1], [], []>} : vector<8x256xbf16>, vector<256x256xbf16>, vector<8x256xf32> -> vector<8x256xf32>
    %13 = arith.truncf %12 : vector<8x256xf32> to vector<8x256xbf16>
    %c0_9 = arith.constant 0 : index
    %c0_10 = arith.constant 0 : index
    %14 = vector.load %arg5[%c0_9, %c0_10] : memref<1x256xf32, #tpu.memory_space<vmem>>, vector<1x256xf32>
    %15 = arith.truncf %14 : vector<1x256xf32> to vector<1x256xbf16>
    %16 = vector.broadcast %15 : vector<1x256xbf16> to vector<8x256xbf16>
    %17 = arith.addf %13, %16 : vector<8x256xbf16>
    %cst_11 = arith.constant 0.000000e+00 : bf16
    %18 = vector.broadcast %cst_11 : bf16 to vector<8x256xbf16>
    %19 = arith.maximumf %17, %18 : vector<8x256xbf16>
    %c0_12 = arith.constant 0 : index
    %c0_13 = arith.constant 0 : index
    %20 = vector.load %arg6[%c0_12, %c0_13] : memref<256x256xbf16, #tpu.memory_space<vmem>>, vector<256x256xbf16>
    %cst_14 = arith.constant dense<0.000000e+00> : vector<8x256xf32>
    %21 = tpu.matmul %19, %20, %cst_14 {dimension_numbers = #tpu.dot_dimension_numbers<[1], [0], [0], [1], [0, 0, 1, 1], [], []>} : vector<8x256xbf16>, vector<256x256xbf16>, vector<8x256xf32> -> vector<8x256xf32>
    %22 = arith.truncf %21 : vector<8x256xf32> to vector<8x256xbf16>
    %c0_15 = arith.constant 0 : index
    %c0_16 = arith.constant 0 : index
    %23 = vector.load %arg7[%c0_15, %c0_16] : memref<1x256xf32, #tpu.memory_space<vmem>>, vector<1x256xf32>
    %24 = arith.truncf %23 : vector<1x256xf32> to vector<1x256xbf16>
    %25 = vector.broadcast %24 : vector<1x256xbf16> to vector<8x256xbf16>
    %26 = arith.addf %22, %25 : vector<8x256xbf16>
    %cst_17 = arith.constant 0.000000e+00 : bf16
    %27 = vector.broadcast %cst_17 : bf16 to vector<8x256xbf16>
    %28 = arith.maximumf %26, %27 : vector<8x256xbf16>
    %c0_18 = arith.constant 0 : index
    %c0_19 = arith.constant 0 : index
    %29 = vector.load %arg8[%c0_18, %c0_19] : memref<256x256xbf16, #tpu.memory_space<vmem>>, vector<256x256xbf16>
    %cst_20 = arith.constant dense<0.000000e+00> : vector<8x256xf32>
    %30 = tpu.matmul %28, %29, %cst_20 {dimension_numbers = #tpu.dot_dimension_numbers<[1], [0], [0], [1], [0, 0, 1, 1], [], []>} : vector<8x256xbf16>, vector<256x256xbf16>, vector<8x256xf32> -> vector<8x256xf32>
    %31 = arith.truncf %30 : vector<8x256xf32> to vector<8x256xbf16>
    %c0_21 = arith.constant 0 : index
    %c0_22 = arith.constant 0 : index
    %32 = vector.load %arg9[%c0_21, %c0_22] : memref<1x256xf32, #tpu.memory_space<vmem>>, vector<1x256xf32>
    %33 = arith.truncf %32 : vector<1x256xf32> to vector<1x256xbf16>
    %34 = vector.broadcast %33 : vector<1x256xbf16> to vector<8x256xbf16>
    %35 = arith.addf %31, %34 : vector<8x256xbf16>
    %cst_23 = arith.constant 0.000000e+00 : bf16
    %36 = vector.broadcast %cst_23 : bf16 to vector<8x256xbf16>
    %37 = arith.maximumf %35, %36 : vector<8x256xbf16>
    %c0_24 = arith.constant 0 : index
    %c0_25 = arith.constant 0 : index
    %38 = vector.load %arg10[%c0_24, %c0_25] : memref<256x256xbf16, #tpu.memory_space<vmem>>, vector<256x256xbf16>
    %cst_26 = arith.constant dense<0.000000e+00> : vector<8x256xf32>
    %39 = tpu.matmul %37, %38, %cst_26 {dimension_numbers = #tpu.dot_dimension_numbers<[1], [0], [0], [1], [0, 0, 1, 1], [], []>} : vector<8x256xbf16>, vector<256x256xbf16>, vector<8x256xf32> -> vector<8x256xf32>
    %40 = arith.truncf %39 : vector<8x256xf32> to vector<8x256xbf16>
    %c0_27 = arith.constant 0 : index
    %c0_28 = arith.constant 0 : index
    %41 = vector.load %arg11[%c0_27, %c0_28] : memref<1x256xf32, #tpu.memory_space<vmem>>, vector<1x256xf32>
    %42 = arith.truncf %41 : vector<1x256xf32> to vector<1x256xbf16>
    %43 = vector.broadcast %42 : vector<1x256xbf16> to vector<8x256xbf16>
    %44 = arith.addf %40, %43 : vector<8x256xbf16>
    %cst_29 = arith.constant 0.000000e+00 : bf16
    %45 = vector.broadcast %cst_29 : bf16 to vector<8x256xbf16>
    %46 = arith.maximumf %44, %45 : vector<8x256xbf16>
    %c0_30 = arith.constant 0 : index
    %c0_31 = arith.constant 0 : index
    %47 = vector.load %arg12[%c0_30, %c0_31] : memref<256x32xbf16, #tpu.memory_space<vmem>>, vector<256x32xbf16>
    %cst_32 = arith.constant dense<0.000000e+00> : vector<8x32xf32>
    %48 = tpu.matmul %46, %47, %cst_32 {dimension_numbers = #tpu.dot_dimension_numbers<[1], [0], [0], [1], [0, 0, 1, 1], [], []>} : vector<8x256xbf16>, vector<256x32xbf16>, vector<8x32xf32> -> vector<8x32xf32>
    %c0_33 = arith.constant 0 : index
    %c0_34 = arith.constant 0 : index
    %49 = vector.load %arg13[%c0_33, %c0_34] : memref<1x32xf32, #tpu.memory_space<vmem>>, vector<1x32xf32>
    %50 = vector.broadcast %49 : vector<1x32xf32> to vector<8x32xf32>
    %51 = arith.addf %48, %50 : vector<8x32xf32>
    %52 = arith.truncf %51 : vector<8x32xf32> to vector<8x32xbf16>
    %c0_35 = arith.constant 0 : index
    %c0_36 = arith.constant 0 : index
    %53 = vector.load %arg14[%c0_35, %c0_36] : memref<8x32xbf16, #tpu.memory_space<vmem>>, vector<8x32xbf16>
    tpu.vector_store %arg14[%c0_35, %c0_36], %52 {strides = array<i32>} : memref<8x32xbf16, #tpu.memory_space<vmem>>, vector<8x32xbf16>,
    return
  }
  func.func @transform_0(%arg0: i32) -> (i32, i32) {
    %c0_i32 = arith.constant 0 : i32
    %c0_i32_0 = arith.constant 0 : i32
    return %arg0, %c0_i32 : i32, i32
  }
  func.func @transform_1(%arg0: i32) -> (i32, i32) {
    %c0_i32 = arith.constant 0 : i32
    %c0_i32_0 = arith.constant 0 : i32
    %c0_i32_1 = arith.constant 0 : i32
    return %c0_i32, %c0_i32_0 : i32, i32
  }
  func.func @transform_2(%arg0: i32) -> (i32, i32) {
    %c0_i32 = arith.constant 0 : i32
    %c0_i32_0 = arith.constant 0 : i32
    %c0_i32_1 = arith.constant 0 : i32
    return %c0_i32, %c0_i32_0 : i32, i32
  }
  func.func @transform_3(%arg0: i32) -> (i32, i32) {
    %c0_i32 = arith.constant 0 : i32
    %c0_i32_0 = arith.constant 0 : i32
    %c0_i32_1 = arith.constant 0 : i32
    return %c0_i32, %c0_i32_0 : i32, i32
  }
  func.func @transform_4(%arg0: i32) -> (i32, i32) {
    %c0_i32 = arith.constant 0 : i32
    %c0_i32_0 = arith.constant 0 : i32
    %c0_i32_1 = arith.constant 0 : i32
    return %c0_i32, %c0_i32_0 : i32, i32
  }
  func.func @transform_5(%arg0: i32) -> (i32, i32) {
    %c0_i32 = arith.constant 0 : i32
    %c0_i32_0 = arith.constant 0 : i32
    %c0_i32_1 = arith.constant 0 : i32
    return %c0_i32, %c0_i32_0 : i32, i32
  }
  func.func @transform_6(%arg0: i32) -> (i32, i32) {
    %c0_i32 = arith.constant 0 : i32
    %c0_i32_0 = arith.constant 0 : i32
    %c0_i32_1 = arith.constant 0 : i32
    return %c0_i32, %c0_i32_0 : i32, i32
  }
  func.func @transform_7(%arg0: i32) -> (i32, i32) {
    %c0_i32 = arith.constant 0 : i32
    %c0_i32_0 = arith.constant 0 : i32
    %c0_i32_1 = arith.constant 0 : i32
    return %c0_i32, %c0_i32_0 : i32, i32
  }
  func.func @transform_8(%arg0: i32) -> (i32, i32) {
    %c0_i32 = arith.constant 0 : i32
    %c0_i32_0 = arith.constant 0 : i32
    %c0_i32_1 = arith.constant 0 : i32
    return %c0_i32, %c0_i32_0 : i32, i32
  }
  func.func @transform_9(%arg0: i32) -> (i32, i32) {
    %c0_i32 = arith.constant 0 : i32
    %c0_i32_0 = arith.constant 0 : i32
    %c0_i32_1 = arith.constant 0 : i32
    return %c0_i32, %c0_i32_0 : i32, i32
  }
  func.func @transform_10(%arg0: i32) -> (i32, i32) {
    %c0_i32 = arith.constant 0 : i32
    %c0_i32_0 = arith.constant 0 : i32
    %c0_i32_1 = arith.constant 0 : i32
    return %c0_i32, %c0_i32_0 : i32, i32
  }
  func.func @transform_11(%arg0: i32) -> (i32, i32) {
    %c0_i32 = arith.constant 0 : i32
    %c0_i32_0 = arith.constant 0 : i32
    %c0_i32_1 = arith.constant 0 : i32
    return %c0_i32, %c0_i32_0 : i32, i32
  }
  func.func @transform_12(%arg0: i32) -> (i32, i32) {
    %c0_i32 = arith.constant 0 : i32
    %c0_i32_0 = arith.constant 0 : i32
    %c0_i32_1 = arith.constant 0 : i32
    return %c0_i32, %c0_i32_0 : i32, i32
  }
  func.func @transform_13(%arg0: i32) -> (i32, i32) {
    %c0_i32 = arith.constant 0 : i32
    %c0_i32_0 = arith.constant 0 : i32
    return %arg0, %c0_i32 : i32, i32
  }
}

</mosaic_0001>

<bundles_post_ra>
// kernel: _lambda_.1
= control target key start
LH: loop header
LB: loop body
LE: loop exit
PB: predicated region body
PF: predicated region fallthrough
CT: control target
= control target key end

     0   :  { %18 = vsyncpa [#allocation3], 0  ;;  %s2836_s0 = inlined_call_operand.hbm [shape: f32[8,107], index: 0, kind: input, shape index: {}]   ;;  %s2837_s1 = inlined_call_operand.hbm [shape: bf16[107,256], index: 1, kind: input, shape index: {}]   ;;  %s2838_s2 = inlined_call_operand.vmem [shape: f32[1,256], index: 2, kind: input, shape index: {}]   ;;  %s2839_s3 = inlined_call_operand.hbm [shape: bf16[256,256], index: 3, kind: input, shape index: {}]   ;;  %s2840_s4 = inlined_call_operand.vmem [shape: f32[1,256], index: 4, kind: input, shape index: {}]   ;;  %s2841_s5 = inlined_call_operand.hbm [shape: bf16[256,256], index: 5, kind: input, shape index: {}]   ;;  %s2842_s6 = inlined_call_operand.vmem [shape: f32[1,256], index: 6, kind: input, shape index: {}]   ;;  %s2843_s7 = inlined_call_operand.hbm [shape: bf16[256,256], index: 7, kind: input, shape index: {}]   ;;  %s2844_s8 = inlined_call_operand.hbm [shape: f32[1,256], index: 8, kind: input, shape index: {}]   ;;  %s2845_s9 = inlined_call_operand.hbm [shape: bf16[256,256], index: 9, kind: input, shape index: {}]   ;;  %s2846_s10 = inlined_call_operand.hbm [shape: f32[1,256], index: 10, kind: input, shape index: {}]   ;;  %s2847_s11 = inlined_call_operand.hbm [shape: bf16[256,32], index: 11, kind: input, shape index: {}]   ;;  %s2848_s12 = inlined_call_operand.hbm [shape: f32[1,32], index: 12, kind: input, shape index: {}]   ;;  %s2849_s13 = inlined_call_operand.vmem [shape: bf16[8,32], index: 13, kind: output, shape index: {}]  }
   0x1   :  { %19 = vsyncpa [#allocation5], 0 }
   0x2   :  { %20 = vsyncpa [#allocation8], 0 }
   0x3   :  { %21 = vsyncpa [#allocation11], 0 }
   0x4   :  { %22 = vsyncpa [#allocation14], 0  ;;  %s39_s27 = sshll.u32 %s2837_s1, 4  ;;  %s40_s27 = int_to_ptr.hbm [resolvable:$true] %s39_s27 }
   0x5   :  { %23 = vsyncpa [#allocation17], 0  ;;  %s2694_s28 = smov [#allocation4]   ;;  %s69_s15 = sshll.u32 %s2841_s5, 4  ;;  %s70_s15 = int_to_ptr.hbm [resolvable:$true] %s69_s15 }
   0x6   :  { %s41_s29 = sshll.u32 %s2694_s28, 4  ;;  %s2695_s16 = smov 128   ;;  %s42_s29 = int_to_ptr.vmem [resolvable:$true] %s41_s29 }
   0x7   :  { %s2696_s17 = smov 8   ;;  %s2697_s18 = smov [#allocation7]  }
   0x8   :  { %47 = dma.hbm_to_vmem [thread:$0]  %s40_s27, 1792, %s42_s29, [#allocation5], %s2695_s16, %s2695_s16, %s2696_s17  }
   0x9   :  { %s71_s19 = sshll.u32 %s2697_s18, 4  ;;  %s98_s21 = sshll.u32 %s2844_s8, 4  ;;  %s72_s19 = int_to_ptr.vmem [resolvable:$true] %s71_s19  ;;  %s99_s21 = int_to_ptr.hbm [resolvable:$true] %s98_s21 }
   0xa   :  { %77 = dma.hbm_to_vmem [thread:$0]  %s70_s15, 4096, %s72_s19, [#allocation8], %s2695_s16, %s2695_s16, %s2696_s17  }
   0xb   :  { %s122_s23 = sshll.u32 %s2846_s10, 4  ;;  %s2698_s24 = smov [#allocation10]   ;;  %s123_s23 = int_to_ptr.hbm [resolvable:$true] %s122_s23 }
   0xc   :  { %s100_s25 = sshll.u32 %s2698_s24, 4  ;;  %s2699_s26 = smov [#allocation13]   ;;  %s101_s25 = int_to_ptr.vmem [resolvable:$true] %s100_s25 }
   0xd   :  { %103 = dma.hbm_to_vmem [thread:$0]  %s99_s21, 32, %s101_s25, [#allocation11]  }
   0xe   :  { %s124_s27 = sshll.u32 %s2699_s26, 4  ;;  %s29_s8 = sshll.u32 %s2836_s0, 4  ;;  %s125_s27 = int_to_ptr.vmem [resolvable:$true] %s124_s27  ;;  %s30_s8 = int_to_ptr.hbm [resolvable:$true] %s29_s8 }
   0xf   :  { %127 = dma.hbm_to_vmem [thread:$0]  %s123_s23, 32, %s125_s27, [#allocation14]  }
  0x10   :  { %s54_s15 = sshll.u32 %s2839_s3, 4  ;;  %s2700_s18 = smov [#allocation2]   ;;  %s55_s15 = int_to_ptr.hbm [resolvable:$true] %s54_s15 }
  0x11   :  { %s31_s10 = sshll.u32 %s2700_s18, 4  ;;  %s2701_s19 = smov [#allocation6]   ;;  %s32_s10 = int_to_ptr.vmem [resolvable:$true] %s31_s10 }
  0x12   :  { %34 = dma.hbm_to_vmem [thread:$0]  %s30_s8, 128, %s32_s10, [#allocation3]  }
  0x13   :  { %s56_s20 = sshll.u32 %s2701_s19, 4  ;;  %s84_s5 = sshll.u32 %s2843_s7, 4  ;;  %s57_s20 = int_to_ptr.vmem [resolvable:$true] %s56_s20  ;;  %s85_s5 = int_to_ptr.hbm [resolvable:$true] %s84_s5 }
  0x14   :  { %62 = dma.hbm_to_vmem [thread:$0]  %s55_s15, 4096, %s57_s20, [#allocation5], %s2695_s16, %s2695_s16, %s2696_s17  }
  0x15   :  { %s108_s3 = sshll.u32 %s2845_s9, 4  ;;  %s2702_s23 = smov [#allocation9]   ;;  %s109_s3 = int_to_ptr.hbm [resolvable:$true] %s108_s3 }
  0x16   :  { %s86_s24 = sshll.u32 %s2702_s23, 4  ;;  %s2703_s25 = smov [#allocation12]   ;;  %s87_s24 = int_to_ptr.vmem [resolvable:$true] %s86_s24 }
  0x17   :  { %92 = dma.hbm_to_vmem [thread:$0]  %s85_s5, 4096, %s87_s24, [#allocation8], %s2695_s16, %s2695_s16, %s2696_s17  }
  0x18   :  { %s110_s7 = sshll.u32 %s2703_s25, 4  ;;  %s132_s28 = sshll.u32 %s2847_s11, 4  ;;  %s111_s7 = int_to_ptr.vmem [resolvable:$true] %s110_s7  ;;  %s133_s28 = int_to_ptr.hbm [resolvable:$true] %s132_s28 }
  0x19   :  { %116 = dma.hbm_to_vmem [thread:$0]  %s109_s3, 4096, %s111_s7, [#allocation11], %s2695_s16, %s2695_s16, %s2696_s17  }
  0x1a   :  { %s2704_s9 = smov [#allocation15]   ;;  %s146_s14 = sshll.u32 %s2848_s12, 4  ;;  %s147_s14 = int_to_ptr.hbm [resolvable:$true] %s146_s14 }
  0x1b   :  { %s134_s29 = sshll.u32 %s2704_s9, 4  ;;  %s2705_s15 = smov 64   ;;  %s135_s29 = int_to_ptr.vmem [resolvable:$true] %s134_s29 }
  0x1c   :  { %s2706_s18 = smov 4   ;;  %s2707_s10 = smov [#allocation16]  }
  0x1d   :  { %140 = dma.hbm_to_vmem [thread:$0]  %s133_s28, 2048, %s135_s29, [#allocation14], %s2705_s15, %s2705_s15, %s2706_s18  }
  0x1e   :  { %s148_s19 = sshll.u32 %s2707_s10, 4  ;;  %s149_s19 = int_to_ptr.vmem [resolvable:$true] %s148_s19 }
  0x1f   :  { %151 = dma.hbm_to_vmem [thread:$0]  %s147_s14, 16, %s149_s19, [#allocation17]  }
  0x20   :  { %2682 = dma.done.wait [#allocation3], 128  }
  0x21   :  { %2683 = vsyncadd [#allocation3], 4294967168 }
  0x22   :  { %2684 = dma.done.wait [#allocation5], 5888  }
  0x23   :  { %2685 = vsyncadd [#allocation5], 4294961408 }
  0x24   :  { %2686 = dma.done.wait [#allocation8], 8192  }
  0x25   :  { %2687 = vsyncadd [#allocation8], 4294959104 }
  0x26   :  { %2688 = dma.done.wait [#allocation11], 4128  }
  0x27   :  { %2689 = vsyncadd [#allocation11], 4294963168 }
  0x28   :  { %2690 = dma.done.wait [#allocation14], 2080  }
  0x29   :  { %2691 = vsyncadd [#allocation14], 4294965216 }
  0x2a   :  { %2692 = dma.done.wait [#allocation17], 16  }
  0x2b   :  { %2693 = vsyncadd [#allocation17], 4294967280  ;;  %vm281_vm0 = vcmask 1044480   ;;  %vm282_vm1 = vcmask 1045504   ;;  %v2708_v0 = vmov 65535   ;;  %vm277_vm2 = vcmask 875520  }
  0x2c   :  { %v283_v1 = vsel %vm281_vm0, 4294967295, %v2708_v0  ;;  %v1684_v3 = vld [vmem:[#allocation4 + $0x60] sm:$0xf]  ;;  %v2281_v4 = vld [vmem:[#allocation4 + $0x64] sm:$0x30]  ;;  %vm1622_vm3 = vcmask 257024  }
  0x2d   :  { %v284_v2 = vsel %vm282_vm1, %v283_v1, 0  ;;  %v2280_v5 = vld [vmem:[#allocation4 + $0x64] sm:$0xf]  ;;  %v1685_v6 = vor.u32 %v2281_v4, %v1684_v3  ;;  %v1686_v7 = vld [vmem:[#allocation4 + $0x68] sm:$0x30] }
  0x2e   :  { %v1689_v8 = vor.u32 %v2280_v5, %v1686_v7  ;;  %v1676_v9 = vld [vmem:[#allocation4 + $0x50] sm:$0xf]  ;;  %v2279_v10 = vld [vmem:[#allocation4 + $0x54] sm:$0xf0]  ;;  %v2278_v12 = vld [vmem:[#allocation4 + $0x54] sm:$0xf] }
  0x2f   :  { %v286_v11 = vand.u32 %v1685_v6, %v284_v2  ;;  %v1678_v13 = vld [vmem:[#allocation4 + $0x58] sm:$0xf0]  ;;  %v1677_v15 = vor.u32 %v2279_v10, %v1676_v9  ;;  %v1668_v17 = vld [vmem:[#allocation4 + $0x40] sm:$0xf]  ;;  %v2277_v18 = vld [vmem:[#allocation4 + $0x44] sm:$0xf0] }
  0x30   :  { %v289_v14 = vand.u32 %v1689_v8, %v284_v2  ;;  %v1681_v16 = vor.u32 %v2278_v12, %v1678_v13  ;;  %v2276_v19 = vld [vmem:[#allocation4 + $0x44] sm:$0xf]  ;;  %v1670_v20 = vld [vmem:[#allocation4 + $0x48] sm:$0xf0]  ;;  %v1669_v21 = vor.u32 %v2277_v18, %v1668_v17  ;;  %v1660_v22 = vld [vmem:[#allocation4 + $0x30] sm:$0xf] }
  0x31   :  { %292 = vmatpush.bf16.msra.mxu0 %v286_v11  ;;  %v2275_v23 = vld [vmem:[#allocation4 + $0x34] sm:$0xf0]  ;;  %v1750_v24 = vld [vmem:[#allocation6 + $0x70] sm:$0xf]  ;;  %v1673_v25 = vor.u32 %v2276_v19, %v1670_v20  ;;  %v2297_v26 = vld [vmem:[#allocation6 + $0x74] sm:$0xf0] }
  0x32   :  { %305 = vmatpush.bf16.msra.mxu1 %v289_v14  ;;  %v1814_v27 = vld [vmem:[#allocation6 + $0xf0] sm:$0xf]  ;;  %v2313_v28 = vld [vmem:[#allocation6 + $0xf4] sm:$0xf0]  ;;  %v2274_v29 = vld [vmem:[#allocation4 + $0x34] sm:$0xf]  ;;  %v1751_v31 = vor.u32 %v2297_v26, %v1750_v24  ;;  %v1661_v35 = vor.u32 %v2275_v23, %v1660_v22 }
  0x33   :  { %v1662_v30 = vld [vmem:[#allocation4 + $0x38] sm:$0xf0]  ;;  %v1815_v32 = vor.u32 %v2313_v28, %v1814_v27  ;;  %v1742_v33 = vld [vmem:[#allocation6 + $0x60] sm:$0xf]  ;;  %v2295_v34 = vld [vmem:[#allocation6 + $0x64] sm:$0xf0] }
  0x34   :  { %v1652_v36 = vld [vmem:[#allocation4 + $0x20] sm:$0xf]  ;;  %543 = vmatpush.bf16.msra.mxu2 %v1751_v31  ;;  %v1743_v37 = vor.u32 %v2295_v34, %v1742_v33  ;;  %v1806_v38 = vld [vmem:[#allocation6 + $0xe0] sm:$0xf]  ;;  %v2311_v39 = vld [vmem:[#allocation6 + $0xe4] sm:$0xf0]  ;;  %v1665_v40 = vor.u32 %v2274_v29, %v1662_v30 }
  0x35   :  { %293 = vmatpush.bf16.msra.mxu0 %v1677_v15  ;;  %v2273_v41 = vld [vmem:[#allocation4 + $0x24] sm:$0xf0]  ;;  %v2272_v42 = vld [vmem:[#allocation4 + $0x24] sm:$0xf]  ;;  %v1654_v43 = vld [vmem:[#allocation4 + $0x28] sm:$0xf0]  ;;  %556 = vmatpush.bf16.msra.mxu3 %v1815_v32  ;;  %v1807_v44 = vor.u32 %v2311_v39, %v1806_v38 }
  0x36   :  { %306 = vmatpush.bf16.msra.mxu1 %v1681_v16  ;;  %v1734_v45 = vld [vmem:[#allocation6 + $0x50] sm:$0xf]  ;;  %v2293_v46 = vld [vmem:[#allocation6 + $0x54] sm:$0xf0]  ;;  %v1653_v49 = vor.u32 %v2273_v41, %v1652_v36  ;;  %v1644_v50 = vld [vmem:[#allocation4 + $0x10] sm:$0xf]  ;;  %v1657_v53 = vor.u32 %v2272_v42, %v1654_v43 }
  0x37   :  { %v1798_v47 = vld [vmem:[#allocation6 + $0xd0] sm:$0xf]  ;;  %v2309_v48 = vld [vmem:[#allocation6 + $0xd4] sm:$0xf0]  ;;  %v2271_v51 = vld [vmem:[#allocation4 + $0x14] sm:$0xf0]  ;;  %v1735_v52 = vor.u32 %v2293_v46, %v1734_v45 }
  0x38   :  { %544 = vmatpush.bf16.msra.mxu2 %v1743_v37  ;;  %v2270_v54 = vld [vmem:[#allocation4 + $0x14] sm:$0xf]  ;;  %v1799_v55 = vor.u32 %v2309_v48, %v1798_v47  ;;  %v1726_v56 = vld [vmem:[#allocation6 + $0x40] sm:$0xf]  ;;  %v2291_v57 = vld [vmem:[#allocation6 + $0x44] sm:$0xf0]  ;;  %v1645_v62 = vor.u32 %v2271_v51, %v1644_v50 }
  0x39   :  { %294 = vmatpush.bf16.msra.mxu0 %v1669_v21  ;;  %557 = vmatpush.bf16.msra.mxu3 %v1807_v44  ;;  %v1646_v58 = vld [vmem:[#allocation4 + $0x18] sm:$0xf0]  ;;  %v1790_v59 = vld [vmem:[#allocation6 + $0xc0] sm:$0xf]  ;;  %v2307_v60 = vld [vmem:[#allocation6 + $0xc4] sm:$0xf0]  ;;  %v1727_v2 = vor.u32 %v2291_v57, %v1726_v56 }
  0x3a   :  { %307 = vmatpush.bf16.msra.mxu1 %v1673_v25  ;;  %v1636_v61 = vld [vmem:[#allocation4] sm:$0xf]  ;;  %v2269_v63 = vld [vmem:[#allocation4 + $0x4] sm:$0xf0]  ;;  %v2268_v0 = vld [vmem:[#allocation4 + $0x4] sm:$0xf]  ;;  %v1649_v3 = vor.u32 %v2270_v54, %v1646_v58  ;;  %v1791_v5 = vor.u32 %v2307_v60, %v1790_v59 }
  0x3b   :  { %v1638_v1 = vld [vmem:[#allocation4 + $0x8] sm:$0xf0]  ;;  %v2296_v4 = vld [vmem:[#allocation6 + $0x74] sm:$0xf]  ;;  %v1718_v6 = vld [vmem:[#allocation6 + $0x30] sm:$0xf]  ;;  %v1637_v13 = vor.u32 %v2269_v63, %v1636_v61 }
  0x3c   :  { %545 = vmatpush.bf16.msra.mxu2 %v1735_v52  ;;  %v2289_v7 = vld [vmem:[#allocation6 + $0x34] sm:$0xf0]  ;;  %v1752_v8 = vld [vmem:[#allocation6 + $0x78] sm:$0xf0]  ;;  %v2312_v9 = vld [vmem:[#allocation6 + $0xf4] sm:$0xf]  ;;  %v1641_v16 = vor.u32 %v2268_v0, %v1638_v1 }
  0x3d   :  { %295 = vmatpush.bf16.msra.mxu0 %v1661_v35  ;;  %558 = vmatpush.bf16.msra.mxu3 %v1799_v55  ;;  %v1816_v10 = vld [vmem:[#allocation6 + $0xf8] sm:$0xf0]  ;;  %v1782_v11 = vld [vmem:[#allocation6 + $0xb0] sm:$0xf]  ;;  %v2305_v12 = vld [vmem:[#allocation6 + $0xb4] sm:$0xf0]  ;;  %v1719_v15 = vor.u32 %v2289_v7, %v1718_v6  ;;  %v1755_v17 = vor.u32 %v2296_v4, %v1752_v8 }
  0x3e   :  { %308 = vmatpush.bf16.msra.mxu1 %v1665_v40  ;;  %v193_v14 = vld [vmem:[#allocation2] sm:$0xff]  ;;  %v1819_v18 = vor.u32 %v2312_v9, %v1816_v10  ;;  %v2294_v19 = vld [vmem:[#allocation6 + $0x64] sm:$0xf]  ;;  %v1783_v21 = vor.u32 %v2305_v12, %v1782_v11  ;;  %v2292_v27 = vld [vmem:[#allocation6 + $0x54] sm:$0xf] }
  0x3f   :  { %v1744_v20 = vld [vmem:[#allocation6 + $0x68] sm:$0xf0]  ;;  %v194_v22 = vpack.c.bf16 %v193_v14, %v193_v14  ;;  %v2310_v23 = vld [vmem:[#allocation6 + $0xe4] sm:$0xf]  ;;  %v1736_v28 = vld [vmem:[#allocation6 + $0x58] sm:$0xf0] }
  0x40   :  { %546 = vmatpush.bf16.msra.mxu2 %v1727_v2  ;;  %v1808_v24 = vld [vmem:[#allocation6 + $0xe8] sm:$0xf0]  ;;  %v1747_v25 = vor.u32 %v2294_v19, %v1744_v20  ;;  %v2308_v29 = vld [vmem:[#allocation6 + $0xd4] sm:$0xf]  ;;  %v1800_v30 = vld [vmem:[#allocation6 + $0xd8] sm:$0xf0]  ;;  %v1739_v31 = vor.u32 %v2292_v27, %v1736_v28 }
  0x41   :  { %296 = vmatpush.bf16.msra.mxu0 %v1653_v49  ;;  %559 = vmatpush.bf16.msra.mxu3 %v1791_v5  ;;  %v1811_v26 = vor.u32 %v2310_v23, %v1808_v24  ;;  %v1803_v32 = vor.u32 %v2308_v29, %v1800_v30  ;;  %v2290_v33 = vld [vmem:[#allocation6 + $0x44] sm:$0xf]  ;;  %v1728_v34 = vld [vmem:[#allocation6 + $0x48] sm:$0xf0]  ;;  %v2288_v39 = vld [vmem:[#allocation6 + $0x34] sm:$0xf] }
  0x42   :  { %309 = vmatpush.bf16.msra.mxu1 %v1657_v53  ;;  %v2306_v35 = vld [vmem:[#allocation6 + $0xc4] sm:$0xf]  ;;  %v1792_v36 = vld [vmem:[#allocation6 + $0xc8] sm:$0xf0]  ;;  %v1731_v37 = vor.u32 %v2290_v33, %v1728_v34  ;;  %v1720_v40 = vld [vmem:[#allocation6 + $0x38] sm:$0xf0] }
  0x43   :  { %v1795_v38 = vor.u32 %v2306_v35, %v1792_v36  ;;  %v2304_v41 = vld [vmem:[#allocation6 + $0xb4] sm:$0xf]  ;;  %v1784_v42 = vld [vmem:[#allocation6 + $0xb8] sm:$0xf0]  ;;  %v1723_v43 = vor.u32 %v2288_v39, %v1720_v40  ;;  %v1710_v45 = vld [vmem:[#allocation6 + $0x20] sm:$0xf] }
  0x44   :  { %547 = vmatpush.bf16.msra.mxu2 %v1719_v15  ;;  %v1787_v44 = vor.u32 %v2304_v41, %v1784_v42  ;;  %v2287_v46 = vld [vmem:[#allocation6 + $0x24] sm:$0xf0]  ;;  %v1774_v47 = vld [vmem:[#allocation6 + $0xa0] sm:$0xf]  ;;  %v2286_v50 = vld [vmem:[#allocation6 + $0x24] sm:$0xf] }
  0x45   :  { %297 = vmatpush.bf16.msra.mxu0 %v1645_v62  ;;  %560 = vmatpush.bf16.msra.mxu3 %v1783_v21  ;;  %v1711_v48 = vor.u32 %v2287_v46, %v1710_v45  ;;  %v2303_v49 = vld [vmem:[#allocation6 + $0xa4] sm:$0xf0]  ;;  %v1712_v51 = vld [vmem:[#allocation6 + $0x28] sm:$0xf0]  ;;  %v2302_v54 = vld [vmem:[#allocation6 + $0xa4] sm:$0xf] }
  0x46   :  { %310 = vmatpush.bf16.msra.mxu1 %v1649_v3  ;;  %v1775_v52 = vor.u32 %v2303_v49, %v1774_v47  ;;  %v1715_v53 = vor.u32 %v2286_v50, %v1712_v51  ;;  %v1776_v55 = vld [vmem:[#allocation6 + $0xa8] sm:$0xf0]  ;;  %v1702_v57 = vld [vmem:[#allocation6 + $0x10] sm:$0xf]  ;;  %v2285_v58 = vld [vmem:[#allocation6 + $0x14] sm:$0xf0] }
  0x47   :  { %v1779_v56 = vor.u32 %v2302_v54, %v1776_v55  ;;  %v1766_v59 = vld [vmem:[#allocation6 + $0x90] sm:$0xf]  ;;  %v1703_v60 = vor.u32 %v2285_v58, %v1702_v57  ;;  %v2301_v61 = vld [vmem:[#allocation6 + $0x94] sm:$0xf0]  ;;  %v2284_v62 = vld [vmem:[#allocation6 + $0x14] sm:$0xf] }
  0x48   :  { %548 = vmatpush.bf16.msra.mxu2 %v1711_v48  ;;  %v1704_v63 = vld [vmem:[#allocation6 + $0x18] sm:$0xf0]  ;;  %v1767_v0 = vor.u32 %v2301_v61, %v1766_v59  ;;  %v2300_v2 = vld [vmem:[#allocation6 + $0x94] sm:$0xf]  ;;  %v318_v5 = vld [vmem:[%s2838_s2] sm:$0x3] }
  0x49   :  { %298 = vmatpush.bf16.msra.mxu0 %v1637_v13  ;;  %561 = vmatpush.bf16.msra.mxu3 %v1775_v52  ;;  %v1707_v1 = vor.u32 %v2284_v62, %v1704_v63  ;;  %v1768_v3 = vld [vmem:[#allocation6 + $0x98] sm:$0xf0]  ;;  %v1694_v6 = vld [vmem:[#allocation6] sm:$0xf]  ;;  %v2283_v7 = vld [vmem:[#allocation6 + $0x4] sm:$0xf0] }
  0x4a   :  { %311 = vmatpush.bf16.msra.mxu1 %v1641_v16  ;;  %v1771_v4 = vor.u32 %v2300_v2, %v1768_v3  ;;  %v1758_v8 = vld [vmem:[#allocation6 + $0x80] sm:$0xf]  ;;  %v1695_v9 = vor.u32 %v2283_v7, %v1694_v6  ;;  %v2299_v10 = vld [vmem:[#allocation6 + $0x84] sm:$0xf0]  ;;  %v2282_v11 = vld [vmem:[#allocation6 + $0x4] sm:$0xf] }
  0x4b   :  { %v1696_v12 = vld [vmem:[#allocation6 + $0x8] sm:$0xf0]  ;;  %v1759_v13 = vor.u32 %v2299_v10, %v1758_v8  ;;  %v2298_v15 = vld [vmem:[#allocation6 + $0x84] sm:$0xf]  ;;  %v321_v19 = vperm.slane %v318_v5, 1 }
  0x4c   :  { %1690 = vmatmul.msk.bf16.vlgmr.msra.gmra.mxu0 %vm277_vm2, %v194_v22  ;;  %549 = vmatpush.bf16.msra.mxu2 %v1703_v60  ;;  %v1699_v14 = vor.u32 %v2282_v11, %v1696_v12  ;;  %v1760_v16 = vld [vmem:[#allocation6 + $0x88] sm:$0xf0]  ;;  %v1878_v20 = vld [vmem:[#allocation7 + $0x70] sm:$0xf]  ;;  %v2329_v21 = vld [vmem:[#allocation7 + $0x74] sm:$0xf0] }
  0x4d   :  { %569 = vmatpush.bf16.msrb.mxu0 %v1755_v17  ;;  %1691 = vmatmul.msk.bf16.vlgmr.msra.gmra.mxu1 %vm277_vm2, %v194_v22  ;;  %v1763_v17 = vor.u32 %v2298_v15, %v1760_v16  ;;  %v1942_v22 = vld [vmem:[#allocation7 + $0xf0] sm:$0xf]  ;;  %v1879_v24 = vor.u32 %v2329_v21, %v1878_v20  ;;  %v1880_v27 = vld [vmem:[#allocation7 + $0x78] sm:$0xf0]  ;;  %v2344_v30 = vld [vmem:[#allocation7 + $0xf4] sm:$0xf] }
  0x4e   :  { %582 = vmatpush.bf16.msrb.mxu1 %v1819_v18  ;;  %562 = vmatpush.bf16.msra.mxu3 %v1767_v0  ;;  %v320_v18 = vperm.slane %v318_v5, 0  ;;  %v2327_v34 = vld [vmem:[#allocation7 + $0x64] sm:$0xf0]  ;;  %v1934_v35 = vld [vmem:[#allocation7 + $0xe0] sm:$0xf] }
  0x4f   :  { %v2343_v36 = vld [vmem:[#allocation7 + $0xe4] sm:$0xf0]  ;;  %v2326_v39 = vld [vmem:[#allocation7 + $0x64] sm:$0xf]  ;;  %v1872_v40 = vld [vmem:[#allocation7 + $0x68] sm:$0xf0] }
  0x50   :  { %550 = vmatpush.bf16.msra.mxu2 %v1695_v9  ;;  %v324_v23 = vpack.c.bf16 %v321_v19, %v320_v18  ;;  %v2342_v41 = vld [vmem:[#allocation7 + $0xe4] sm:$0xf]  ;;  %v1936_v45 = vld [vmem:[#allocation7 + $0xe8] sm:$0xf0]  ;;  %v1862_v46 = vld [vmem:[#allocation7 + $0x50] sm:$0xf] }
  0x51   :  { %570 = vmatpush.bf16.msrb.mxu0 %v1747_v25  ;;  %v2345_v25 = vld [vmem:[#allocation7 + $0xf4] sm:$0xf0]  ;;  %v1939_v48 = vor.u32 %v2342_v41, %v1936_v45  ;;  %v1926_v49 = vld [vmem:[#allocation7 + $0xd0] sm:$0xf]  ;;  %v2324_v51 = vld [vmem:[#allocation7 + $0x54] sm:$0xf] }
  0x52   :  { %583 = vmatpush.bf16.msrb.mxu1 %v1811_v26  ;;  %563 = vmatpush.bf16.msra.mxu3 %v1759_v13  ;;  %v2328_v26 = vld [vmem:[#allocation7 + $0x74] sm:$0xf]  ;;  %v1943_v28 = vor.u32 %v2345_v25, %v1942_v22  ;;  %v326_v42 = vunpack.c.l.b16 %v324_v23  ;;  %v2325_v47 = vld [vmem:[#allocation7 + $0x54] sm:$0xf0]  ;;  %v1928_v55 = vld [vmem:[#allocation7 + $0xd8] sm:$0xf0] }
  0x53   :  { %v1883_v29 = vor.u32 %v2328_v26, %v1880_v27  ;;  %v2341_v50 = vld [vmem:[#allocation7 + $0xd4] sm:$0xf0]  ;;  %v1863_v52 = vor.u32 %v2325_v47, %v1862_v46  ;;  %v2340_v54 = vld [vmem:[#allocation7 + $0xd4] sm:$0xf]  ;;  %v1854_v16 = vld [vmem:[#allocation7 + $0x40] sm:$0xf] }
  0x54   :  { %821 = vmatpush.bf16.msrb.mxu2 %v1879_v24  ;;  %v328_v58 = vpack.c.b16 %v326_v42, %v326_v42  ;;  %v1931_v60 = vor.u32 %v2340_v54, %v1928_v55  ;;  %v1918_v18 = vld [vmem:[#allocation7 + $0xc0] sm:$0xf]  ;;  %v2339_v20 = vld [vmem:[#allocation7 + $0xc4] sm:$0xf0]  ;;  %v2322_v21 = vld [vmem:[#allocation7 + $0x44] sm:$0xf] }
  0x55   :  { %571 = vmatpush.bf16.msrb.mxu0 %v1739_v31  ;;  %v1944_v31 = vld [vmem:[#allocation7 + $0xf8] sm:$0xf0]  ;;  %v1856_v22 = vld [vmem:[#allocation7 + $0x48] sm:$0xf0]  ;;  %v2338_v25 = vld [vmem:[#allocation7 + $0xc4] sm:$0xf] }
  0x56   :  { %584 = vmatpush.bf16.msrb.mxu1 %v1803_v32  ;;  %v1870_v32 = vld [vmem:[#allocation7 + $0x60] sm:$0xf]  ;;  %v1947_v33 = vor.u32 %v2344_v30, %v1944_v31  ;;  %834 = vmatpush.bf16.msrb.mxu3 %v1943_v28  ;;  %v331_v61 = vpack.i.b16 %v328_v58, %v328_v58  ;;  %v1859_v24 = vor.u32 %v2322_v21, %v1856_v22  ;;  %v1920_v26 = vld [vmem:[#allocation7 + $0xc8] sm:$0xf0]  ;;  %v1846_v28 = vld [vmem:[#allocation7 + $0x30] sm:$0xf] }
  0x57   :  { %v1923_v27 = vor.u32 %v2338_v25, %v1920_v26  ;;  %v1910_v30 = vld [vmem:[#allocation7 + $0xb0] sm:$0xf]  ;;  %v2319_v41 = vld [vmem:[#allocation7 + $0x24] sm:$0xf0]  ;;  %v1902_v42 = vld [vmem:[#allocation7 + $0xa0] sm:$0xf] }
  0x58   :  { %v333_v63 = vperm.slane %v331_v61, 0  ;;  %v2318_v45 = vld [vmem:[#allocation7 + $0x24] sm:$0xf]  ;;  %v1840_v46 = vld [vmem:[#allocation7 + $0x28] sm:$0xf0] }
  0x59   :  { %572 = vmatpush.bf16.msrb.mxu0 %v1731_v37  ;;  %v1871_v37 = vor.u32 %v2327_v34, %v1870_v32  ;;  %v2337_v32 = vld [vmem:[#allocation7 + $0xb4] sm:$0xf0]  ;;  %v1848_v34 = vld [vmem:[#allocation7 + $0x38] sm:$0xf0]  ;;  %v1894_v54 = vld [vmem:[#allocation7 + $0x90] sm:$0xf] }
  0x5a   :  { %585 = vmatpush.bf16.msrb.mxu1 %v1795_v38  ;;  %v1935_v38 = vor.u32 %v2343_v36, %v1934_v35  ;;  %v1911_v35 = vor.u32 %v2337_v32, %v1910_v30  ;;  %v1832_v58 = vld [vmem:[#allocation7 + $0x18] sm:$0xf0]  ;;  %v2332_v61 = vld [vmem:[#allocation7 + $0x94] sm:$0xf]  ;;  %v2062_v30 = vld [vmem:[#allocation9 + $0xe0] sm:$0xf] }
  0x5b   :  { %822 = vmatpush.bf16.msrb.mxu2 %v1871_v37  ;;  %v2336_v37 = vld [vmem:[#allocation7 + $0xb4] sm:$0xf]  ;;  %v2008_v22 = vld [vmem:[#allocation9 + $0x78] sm:$0xf0] }
  0x5c   :  { %835 = vmatpush.bf16.msrb.mxu3 %v1935_v38  ;;  %v1912_v38 = vld [vmem:[#allocation7 + $0xb8] sm:$0xf0]  ;;  %v2360_v21 = vld [vmem:[#allocation9 + $0x74] sm:$0xf] }
  0x5d   :  { %573 = vmatpush.bf16.msrb.mxu0 %v1723_v43  ;;  %v327_v43 = vunpack.c.h.b16 %v324_v23  ;;  %v1919_v23 = vor.u32 %v2339_v20, %v1918_v18  ;;  %v2377_v20 = vld [vmem:[#allocation9 + $0xf4] sm:$0xf0]  ;;  %v2376_v25 = vld [vmem:[#allocation9 + $0xf4] sm:$0xf]  ;;  %v2072_v26 = vld [vmem:[#allocation9 + $0xf8] sm:$0xf0] }
  0x5e   :  { %586 = vmatpush.bf16.msrb.mxu1 %v1787_v44  ;;  %v1875_v44 = vor.u32 %v2326_v39, %v1872_v40  ;;  %v1915_v39 = vor.u32 %v2336_v37, %v1912_v38  ;;  %v1838_v40 = vld [vmem:[#allocation7 + $0x20] sm:$0xf] }
  0x5f   :  { %v329_v59 = vpack.c.b16 %v327_v43, %v327_v43  ;;  %823 = vmatpush.bf16.msrb.mxu2 %v1863_v52  ;;  %v1839_v43 = vor.u32 %v2319_v41, %v1838_v40  ;;  %v1830_v52 = vld [vmem:[#allocation7 + $0x10] sm:$0xf]  ;;  %v2064_v40 = vld [vmem:[#allocation9 + $0xe8] sm:$0xf0] }
  0x60   :  { %v1990_v41 = vld [vmem:[#allocation9 + $0x50] sm:$0xf] }
  0x61   :  { %574 = vmatpush.bf16.msrb.mxu0 %v1715_v53  ;;  %v1864_v53 = vld [vmem:[#allocation7 + $0x58] sm:$0xf0]  ;;  %v335_v62 = vpack.i.b16 %v329_v59, %v329_v59 }
  0x62   :  { %587 = vmatpush.bf16.msrb.mxu1 %v1779_v56  ;;  %v1927_v56 = vor.u32 %v2341_v50, %v1926_v49  ;;  %v1867_v57 = vor.u32 %v2324_v51, %v1864_v53  ;;  %v2334_v49 = vld [vmem:[#allocation7 + $0xa4] sm:$0xf]  ;;  %v1904_v50 = vld [vmem:[#allocation7 + $0xa8] sm:$0xf0]  ;;  %v2317_v53 = vld [vmem:[#allocation7 + $0x14] sm:$0xf0] }
  0x63   :  { %v337_v0 = vperm.slane %v335_v62, 0  ;;  %v1907_v51 = vor.u32 %v2334_v49, %v1904_v50  ;;  %v1831_v55 = vor.u32 %v2317_v53, %v1830_v52  ;;  %v1896_v62 = vld [vmem:[#allocation7 + $0x98] sm:$0xf0]  ;;  %v2372_v49 = vld [vmem:[#allocation9 + $0xd4] sm:$0xf] }
  0x64   :  { %836 = vmatpush.bf16.msrb.mxu3 %v1927_v56  ;;  %v2333_v56 = vld [vmem:[#allocation7 + $0x94] sm:$0xf0]  ;;  %v2056_v50 = vld [vmem:[#allocation9 + $0xd8] sm:$0xf0] }
  0x65   :  { %575 = vmatpush.bf16.msrb.mxu0 %v1707_v1  ;;  %v341_v5 = vunpack.c.l.bf16 %v337_v0  ;;  %v1895_v59 = vor.u32 %v2333_v56, %v1894_v54  ;;  %v596_v0 = vld [vmem:[%s2840_s4] sm:$0x3] }
  0x66   :  { %588 = vmatpush.bf16.msrb.mxu1 %v1771_v4  ;;  %v340_v4 = vunpack.c.l.bf16 %v333_v63  ;;  %v1899_v63 = vor.u32 %v2332_v61, %v1896_v62 }
  0x68   :  { %837 = vmatpush.bf16.msrb.mxu3 %v1919_v23 }
  0x69   :  { %576 = vmatpush.bf16.msrb.mxu0 %v1699_v14 }
  0x6a   :  { %589 = vmatpush.bf16.msrb.mxu1 %v1763_v17  ;;  %v2323_v17 = vld [vmem:[#allocation7 + $0x44] sm:$0xf0] }
  0x6b   :  { %v1855_v19 = vor.u32 %v2323_v17, %v1854_v16  ;;  %v2361_v16 = vld [vmem:[#allocation9 + $0x74] sm:$0xf0]  ;;  %v2070_v17 = vld [vmem:[#allocation9 + $0xf0] sm:$0xf] }
  0x6c   :  { %838 = vmatpush.bf16.msrb.mxu3 %v1911_v35  ;;  %v2071_v23 = vor.u32 %v2377_v20, %v2070_v17  ;;  %v2000_v35 = vld [vmem:[#allocation9 + $0x68] sm:$0xf0]  ;;  %v1982_v17 = vld [vmem:[#allocation9 + $0x40] sm:$0xf] }
  0x6d   :  { %847 = vmatpush.bf16.msra.mxu0 %v1883_v29  ;;  %824 = vmatpush.bf16.msrb.mxu2 %v1855_v19  ;;  %v2321_v29 = vld [vmem:[#allocation7 + $0x34] sm:$0xf0] }
  0x6e   :  { %860 = vmatpush.bf16.msra.mxu1 %v1947_v33  ;;  %v1847_v31 = vor.u32 %v2321_v29, %v1846_v28  ;;  %v2320_v33 = vld [vmem:[#allocation7 + $0x34] sm:$0xf]  ;;  %v2075_v28 = vor.u32 %v2376_v25, %v2072_v26  ;;  %v2359_v29 = vld [vmem:[#allocation9 + $0x64] sm:$0xf0]  ;;  %v2370_v26 = vld [vmem:[#allocation9 + $0xc4] sm:$0xf] }
  0x6f   :  { %v1851_v36 = vor.u32 %v2320_v33, %v1848_v34  ;;  %v2358_v34 = vld [vmem:[#allocation9 + $0x64] sm:$0xf] }
  0x71   :  { %848 = vmatpush.bf16.msra.mxu0 %v1875_v44  ;;  %825 = vmatpush.bf16.msrb.mxu2 %v1847_v31  ;;  %v2335_v44 = vld [vmem:[#allocation7 + $0xa4] sm:$0xf0] }
  0x72   :  { %861 = vmatpush.bf16.msra.mxu1 %v1939_v48  ;;  %v1903_v47 = vor.u32 %v2335_v44, %v1902_v42  ;;  %v1843_v48 = vor.u32 %v2318_v45, %v1840_v46  ;;  %v2375_v31 = vld [vmem:[#allocation9 + $0xe4] sm:$0xf0]  ;;  %v2357_v42 = vld [vmem:[#allocation9 + $0x54] sm:$0xf0]  ;;  %v2054_v44 = vld [vmem:[#allocation9 + $0xd0] sm:$0xf] }
  0x73   :  { %v2063_v33 = vor.u32 %v2375_v31, %v2062_v30  ;;  %v2373_v45 = vld [vmem:[#allocation9 + $0xd4] sm:$0xf0]  ;;  %v2356_v46 = vld [vmem:[#allocation9 + $0x54] sm:$0xf]  ;;  %v2038_v31 = vld [vmem:[#allocation9 + $0xb0] sm:$0xf] }
  0x74   :  { %839 = vmatpush.bf16.msrb.mxu3 %v1903_v47  ;;  %v1991_v47 = vor.u32 %v2357_v42, %v1990_v41  ;;  %v2353_v30 = vld [vmem:[#allocation9 + $0x34] sm:$0xf0]  ;;  %v1966_v41 = vld [vmem:[#allocation9 + $0x20] sm:$0xf]  ;;  %v2351_v42 = vld [vmem:[#allocation9 + $0x24] sm:$0xf0] }
  0x75   :  { %849 = vmatpush.bf16.msra.mxu0 %v1867_v57  ;;  %826 = vmatpush.bf16.msrb.mxu2 %v1839_v43  ;;  %v2316_v57 = vld [vmem:[#allocation7 + $0x14] sm:$0xf] }
  0x76   :  { %862 = vmatpush.bf16.msra.mxu1 %v1931_v60  ;;  %v1835_v60 = vor.u32 %v2316_v57, %v1832_v58 }
  0x78   :  { %840 = vmatpush.bf16.msrb.mxu3 %v1895_v59 }
  0x79   :  { %850 = vmatpush.bf16.msra.mxu0 %v1859_v24  ;;  %827 = vmatpush.bf16.msrb.mxu2 %v1831_v55  ;;  %v2011_v24 = vor.u32 %v2360_v21, %v2008_v22  ;;  %v2059_v55 = vor.u32 %v2372_v49, %v2056_v50  ;;  %v2371_v21 = vld [vmem:[#allocation9 + $0xc4] sm:$0xf0]  ;;  %v2354_v22 = vld [vmem:[#allocation9 + $0x44] sm:$0xf] }
  0x7a   :  { %863 = vmatpush.bf16.msra.mxu1 %v1923_v27  ;;  %v1998_v27 = vld [vmem:[#allocation9 + $0x60] sm:$0xf]  ;;  %v2366_v50 = vld [vmem:[#allocation9 + $0xa4] sm:$0xf] }
  0x7b   :  { %v1999_v32 = vor.u32 %v2359_v29, %v1998_v27  ;;  %v2048_v27 = vld [vmem:[#allocation9 + $0xc8] sm:$0xf0]  ;;  %v1974_v29 = vld [vmem:[#allocation9 + $0x30] sm:$0xf] }
  0x7d   :  { %851 = vmatpush.bf16.msra.mxu0 %v1851_v36  ;;  %v2374_v36 = vld [vmem:[#allocation9 + $0xe4] sm:$0xf] }
  0x7e   :  { %864 = vmatpush.bf16.msra.mxu1 %v1915_v39  ;;  %v2003_v39 = vor.u32 %v2358_v34, %v2000_v35  ;;  %v2067_v43 = vor.u32 %v2374_v36, %v2064_v40  ;;  %v2352_v34 = vld [vmem:[#allocation9 + $0x34] sm:$0xf]  ;;  %v1976_v35 = vld [vmem:[#allocation9 + $0x38] sm:$0xf0] }
  0x81   :  { %852 = vmatpush.bf16.msra.mxu0 %v1843_v48  ;;  %v1992_v48 = vld [vmem:[#allocation9 + $0x58] sm:$0xf0] }
  0x82   :  { %865 = vmatpush.bf16.msra.mxu1 %v1907_v51  ;;  %v2055_v51 = vor.u32 %v2373_v45, %v2054_v44  ;;  %v1995_v52 = vor.u32 %v2356_v46, %v1992_v48  ;;  %v1967_v44 = vor.u32 %v2351_v42, %v1966_v41  ;;  %v2367_v45 = vld [vmem:[#allocation9 + $0xa4] sm:$0xf0]  ;;  %v2350_v46 = vld [vmem:[#allocation9 + $0x24] sm:$0xf]  ;;  %v2192_v41 = vld [vmem:[#allocation12 + $0xe8] sm:$0xf0] }
  0x83   :  { %v2118_v42 = vld [vmem:[#allocation12 + $0x50] sm:$0xf] }
  0x85   :  { %853 = vmatpush.bf16.msra.mxu0 %v1835_v60 }
  0x86   :  { %866 = vmatpush.bf16.msra.mxu1 %v1899_v63 }
  0xc9   :  { %v300_v1 = vpop.f32.mrf.mxu0 }
  0xca   :  { %v313_v2 = vpop.f32.mrf.mxu1 }
  0xcb   :  { %v317_v3 = vpack.c.bf16 %v313_v2, %v300_v1  ;;  %v1822_v1 = vld [vmem:[#allocation7] sm:$0xf]  ;;  %v2315_v2 = vld [vmem:[#allocation7 + $0x4] sm:$0xf0] }
  0xcd   :  { %v338_v6 = vunpack.c.l.bf16 %v317_v3  ;;  %v339_v7 = vunpack.c.h.bf16 %v317_v3  ;;  %v1886_v3 = vld [vmem:[#allocation7 + $0x80] sm:$0xf] }
  0xcf   :  { %v342_v8 = vadd.f32 %v340_v4, %v338_v6  ;;  %v343_v9 = vadd.f32 %v341_v5, %v339_v7  ;;  %v1823_v4 = vor.u32 %v2315_v2, %v1822_v1  ;;  %v2331_v5 = vld [vmem:[#allocation7 + $0x84] sm:$0xf0]  ;;  %v2314_v6 = vld [vmem:[#allocation7 + $0x4] sm:$0xf]  ;;  %v1824_v7 = vld [vmem:[#allocation7 + $0x8] sm:$0xf0] }
  0xd1   :  { %v302_v10 = vpop.f32.mrf.mxu0  ;;  %v347_v11 = vmax.f32 %v342_v8, 0.0  ;;  %v348_v12 = vmax.f32 %v343_v9, 0.0  ;;  %v1887_v8 = vor.u32 %v2331_v5, %v1886_v3  ;;  %v1827_v9 = vor.u32 %v2314_v6, %v1824_v7  ;;  %828 = vmatpush.bf16.msrb.mxu2 %v1823_v4 }
  0xd2   :  { %v315_v13 = vpop.f32.mrf.mxu1  ;;  %v2330_v10 = vld [vmem:[#allocation7 + $0x84] sm:$0xf] }
  0xd3   :  { %v349_v14 = vpack.c.bf16 %v347_v11, %v347_v11  ;;  %v350_v15 = vpack.c.bf16 %v348_v12, %v348_v12  ;;  %v1888_v11 = vld [vmem:[#allocation7 + $0x88] sm:$0xf0]  ;;  %v598_v13 = vperm.slane %v596_v0, 0  ;;  %841 = vmatpush.bf16.msrb.mxu3 %v1887_v8  ;;  %854 = vmatpush.bf16.msra.mxu0 %v1827_v9 }
  0xd4   :  { %v1891_v12 = vor.u32 %v2330_v10, %v1888_v11 }
  0xd5   :  { %551 = vmatmul.bf16.vlgmr.msra.gmra.mxu2 %v349_v14  ;;  %564 = vmatmul.bf16.vlgmr.msra.gmra.mxu3 %v350_v15 }
  0xd6   :  { %577 = vmatmul.bf16.vlgmr.msrb.gmra.mxu0 %v349_v14  ;;  %590 = vmatmul.bf16.vlgmr.msrb.gmra.mxu1 %v350_v15  ;;  %v599_v14 = vperm.slane %v596_v0, 1  ;;  %v2006_v15 = vld [vmem:[#allocation9 + $0x70] sm:$0xf] }
  0xd7   :  { %867 = vmatpush.bf16.msra.mxu1 %v1891_v12  ;;  %v2007_v19 = vor.u32 %v2361_v16, %v2006_v15  ;;  %1112 = vmatpush.bf16.msra.mxu3 %v2071_v23  ;;  %v1984_v23 = vld [vmem:[#allocation9 + $0x48] sm:$0xf0] }
  0xd8   :  { %v602_v18 = vpack.c.bf16 %v599_v14, %v598_v13  ;;  %1125 = vmatpush.bf16.msrb.mxu0 %v2011_v24  ;;  %v1987_v25 = vor.u32 %v2354_v22, %v1984_v23  ;;  %v2392_v22 = vld [vmem:[#allocation12 + $0x74] sm:$0xf]  ;;  %v2136_v23 = vld [vmem:[#allocation12 + $0x78] sm:$0xf0] }
  0xd9   :  { %1099 = vmatpush.bf16.msra.mxu2 %v2007_v19  ;;  %v2046_v19 = vld [vmem:[#allocation9 + $0xc0] sm:$0xf] }
  0xda   :  { %v604_v37 = vunpack.c.l.b16 %v602_v18  ;;  %v605_v38 = vunpack.c.h.b16 %v602_v18  ;;  %v2355_v18 = vld [vmem:[#allocation9 + $0x44] sm:$0xf0]  ;;  %v2047_v24 = vor.u32 %v2371_v21, %v2046_v19  ;;  %v2409_v21 = vld [vmem:[#allocation12 + $0xf4] sm:$0xf0] }
  0xdb   :  { %1138 = vmatpush.bf16.msrb.mxu1 %v2075_v28  ;;  %1113 = vmatpush.bf16.msra.mxu3 %v2063_v33  ;;  %v1983_v20 = vor.u32 %v2355_v18, %v1982_v17  ;;  %v2051_v28 = vor.u32 %v2370_v26, %v2048_v27  ;;  %v2369_v33 = vld [vmem:[#allocation9 + $0xb4] sm:$0xf0]  ;;  %v2198_v18 = vld [vmem:[#allocation12 + $0xf0] sm:$0xf]  ;;  %v2200_v27 = vld [vmem:[#allocation12 + $0xf8] sm:$0xf0] }
  0xdc   :  { %1126 = vmatpush.bf16.msrb.mxu0 %v2003_v39  ;;  %v606_v53 = vpack.c.b16 %v604_v37, %v604_v37  ;;  %v607_v54 = vpack.c.b16 %v605_v38, %v605_v38  ;;  %v2039_v36 = vor.u32 %v2369_v33, %v2038_v31  ;;  %v1979_v37 = vor.u32 %v2352_v34, %v1976_v35  ;;  %v2368_v38 = vld [vmem:[#allocation9 + $0xb4] sm:$0xf]  ;;  %v2040_v39 = vld [vmem:[#allocation9 + $0xb8] sm:$0xf0]  ;;  %v2190_v31 = vld [vmem:[#allocation12 + $0xe0] sm:$0xf] }
  0xdd   :  { %1100 = vmatpush.bf16.msra.mxu2 %v1999_v32  ;;  %v1975_v32 = vor.u32 %v2353_v30, %v1974_v29  ;;  %v2043_v40 = vor.u32 %v2368_v38, %v2040_v39  ;;  %v2393_v17 = vld [vmem:[#allocation12 + $0x74] sm:$0xf0]  ;;  %v2408_v26 = vld [vmem:[#allocation12 + $0xf4] sm:$0xf]  ;;  %v2391_v30 = vld [vmem:[#allocation12 + $0x64] sm:$0xf0] }
  0xde   :  { %v609_v58 = vpack.i.b16 %v606_v53, %v606_v53  ;;  %v613_v59 = vpack.i.b16 %v607_v54, %v607_v54  ;;  %v1958_v53 = vld [vmem:[#allocation9 + $0x10] sm:$0xf]  ;;  %v2349_v54 = vld [vmem:[#allocation9 + $0x14] sm:$0xf0]  ;;  %v2203_v29 = vor.u32 %v2408_v26, %v2200_v27  ;;  %v2390_v35 = vld [vmem:[#allocation12 + $0x64] sm:$0xf] }
  0xdf   :  { %1139 = vmatpush.bf16.msrb.mxu1 %v2067_v43  ;;  %1114 = vmatpush.bf16.msra.mxu3 %v2055_v51  ;;  %v2030_v43 = vld [vmem:[#allocation9 + $0xa0] sm:$0xf]  ;;  %v2032_v51 = vld [vmem:[#allocation9 + $0xa8] sm:$0xf0]  ;;  %v2402_v27 = vld [vmem:[#allocation12 + $0xc4] sm:$0xf] }
  0xe0   :  { %1127 = vmatpush.bf16.msrb.mxu0 %v1995_v52  ;;  %v611_v60 = vperm.slane %v609_v58, 0  ;;  %v615_v61 = vperm.slane %v613_v59, 0  ;;  %v2031_v48 = vor.u32 %v2367_v45, %v2030_v43  ;;  %v2035_v52 = vor.u32 %v2366_v50, %v2032_v51  ;;  %v2348_v58 = vld [vmem:[#allocation9 + $0x14] sm:$0xf]  ;;  %v2389_v43 = vld [vmem:[#allocation12 + $0x54] sm:$0xf0] }
  0xe1   :  { %1101 = vmatpush.bf16.msra.mxu2 %v1991_v47  ;;  %v1968_v47 = vld [vmem:[#allocation9 + $0x28] sm:$0xf0]  ;;  %v2182_v45 = vld [vmem:[#allocation12 + $0xd0] sm:$0xf]  ;;  %v2404_v50 = vld [vmem:[#allocation12 + $0xd4] sm:$0xf] }
  0xe2   :  { %v618_v5 = vunpack.c.l.bf16 %v611_v60  ;;  %v619_v6 = vunpack.c.l.bf16 %v615_v61  ;;  %v1971_v49 = vor.u32 %v2350_v46, %v1968_v47  ;;  %v1960_v60 = vld [vmem:[#allocation9 + $0x18] sm:$0xf0]  ;;  %v2364_v61 = vld [vmem:[#allocation9 + $0x94] sm:$0xf] }
  0xe3   :  { %1140 = vmatpush.bf16.msrb.mxu1 %v2059_v55  ;;  %1115 = vmatpush.bf16.msra.mxu3 %v2047_v24  ;;  %v2022_v55 = vld [vmem:[#allocation9 + $0x90] sm:$0xf]  ;;  %v2199_v24 = vor.u32 %v2409_v21, %v2198_v18  ;;  %v2405_v46 = vld [vmem:[#allocation12 + $0xd4] sm:$0xf0]  ;;  %v2388_v47 = vld [vmem:[#allocation12 + $0x54] sm:$0xf] }
  0xe4   :  { %1128 = vmatpush.bf16.msrb.mxu0 %v1987_v25  ;;  %v2139_v25 = vor.u32 %v2392_v22, %v2136_v23  ;;  %v2184_v51 = vld [vmem:[#allocation12 + $0xd8] sm:$0xf0]  ;;  %v2110_v18 = vld [vmem:[#allocation12 + $0x40] sm:$0xf]  ;;  %v2403_v22 = vld [vmem:[#allocation12 + $0xc4] sm:$0xf0] }
  0xe5   :  { %1102 = vmatpush.bf16.msra.mxu2 %v1983_v20  ;;  %v2386_v23 = vld [vmem:[#allocation12 + $0x44] sm:$0xf] }
  0xe7   :  { %1141 = vmatpush.bf16.msrb.mxu1 %v2051_v28  ;;  %1116 = vmatpush.bf16.msra.mxu3 %v2039_v36  ;;  %v2126_v28 = vld [vmem:[#allocation12 + $0x60] sm:$0xf]  ;;  %v2128_v36 = vld [vmem:[#allocation12 + $0x68] sm:$0xf0] }
  0xe8   :  { %1129 = vmatpush.bf16.msrb.mxu0 %v1979_v37  ;;  %v2127_v33 = vor.u32 %v2391_v30, %v2126_v28  ;;  %v2406_v37 = vld [vmem:[#allocation12 + $0xe4] sm:$0xf]  ;;  %v2176_v28 = vld [vmem:[#allocation12 + $0xc8] sm:$0xf0]  ;;  %v2102_v30 = vld [vmem:[#allocation12 + $0x30] sm:$0xf] }
  0xe9   :  { %1103 = vmatpush.bf16.msra.mxu2 %v1975_v32  ;;  %v2407_v32 = vld [vmem:[#allocation12 + $0xe4] sm:$0xf0] }
  0xea   :  { %v2191_v34 = vor.u32 %v2407_v32, %v2190_v31  ;;  %v2385_v31 = vld [vmem:[#allocation12 + $0x34] sm:$0xf0]  ;;  %v2166_v32 = vld [vmem:[#allocation12 + $0xb0] sm:$0xf] }
  0xeb   :  { %1142 = vmatpush.bf16.msrb.mxu1 %v2043_v40  ;;  %1117 = vmatpush.bf16.msra.mxu3 %v2031_v48  ;;  %v2131_v40 = vor.u32 %v2390_v35, %v2128_v36  ;;  %v2119_v48 = vor.u32 %v2389_v43, %v2118_v42  ;;  %v2384_v35 = vld [vmem:[#allocation12 + $0x34] sm:$0xf]  ;;  %v2104_v36 = vld [vmem:[#allocation12 + $0x38] sm:$0xf0]  ;;  %v2094_v42 = vld [vmem:[#allocation12 + $0x20] sm:$0xf] }
  0xec   :  { %1130 = vmatpush.bf16.msrb.mxu0 %v1971_v49  ;;  %v2120_v49 = vld [vmem:[#allocation12 + $0x58] sm:$0xf0]  ;;  %v2383_v43 = vld [vmem:[#allocation12 + $0x24] sm:$0xf0] }
  0xed   :  { %1104 = vmatpush.bf16.msra.mxu2 %v1967_v44  ;;  %v2195_v44 = vor.u32 %v2406_v37, %v2192_v41 }
  0xef   :  { %1143 = vmatpush.bf16.msrb.mxu1 %v2035_v52  ;;  %v2183_v52 = vor.u32 %v2405_v46, %v2182_v45  ;;  %v2095_v45 = vor.u32 %v2383_v43, %v2094_v42  ;;  %v2399_v46 = vld [vmem:[#allocation12 + $0xa4] sm:$0xf0] }
 0x153   :  { %v578_v56 = vpop.f32.mrf.mxu0  ;;  %v591_v57 = vpop.f32.mrf.mxu1 }
 0x154   :  { %v592_v0 = vadd.f32 %v591_v57, %v578_v56  ;;  %v1959_v56 = vor.u32 %v2349_v54, %v1958_v53  ;;  %v2365_v57 = vld [vmem:[#allocation9 + $0x94] sm:$0xf0]  ;;  %v2123_v53 = vor.u32 %v2388_v47, %v2120_v49  ;;  %v2382_v47 = vld [vmem:[#allocation12 + $0x24] sm:$0xf] }
 0x155   :  { %v2023_v59 = vor.u32 %v2365_v57, %v2022_v55 }
 0x156   :  { %1105 = vmatpush.bf16.msra.mxu2 %v1959_v56  ;;  %v2187_v56 = vor.u32 %v2404_v50, %v2184_v51  ;;  %v2398_v51 = vld [vmem:[#allocation12 + $0xa4] sm:$0xf] }
 0x157   :  { %1118 = vmatpush.bf16.msra.mxu3 %v2023_v59 }
 0x158   :  { %v552_v62 = vpop.f32.mrf.mxu2  ;;  %v565_v63 = vpop.f32.mrf.mxu3 }
 0x159   :  { %v566_v1 = vadd.f32 %v565_v63, %v552_v62  ;;  %v2024_v62 = vld [vmem:[#allocation9 + $0x98] sm:$0xf0]  ;;  %v874_v63 = vld [vmem:[%s2842_s6] sm:$0x3] }
 0x15b   :  { %v595_v2 = vpack.c.bf16 %v592_v0, %v566_v1  ;;  %v580_v3 = vpop.f32.mrf.mxu0  ;;  %v593_v4 = vpop.f32.mrf.mxu1  ;;  %v1963_v0 = vor.u32 %v2348_v58, %v1960_v60  ;;  %v2027_v1 = vor.u32 %v2364_v61, %v2024_v62 }
 0x15c   :  { %v2347_v3 = vld [vmem:[#allocation9 + $0x4] sm:$0xf0]  ;;  %v2014_v4 = vld [vmem:[#allocation9 + $0x80] sm:$0xf] }
 0x15d   :  { %v616_v7 = vunpack.c.l.bf16 %v595_v2  ;;  %v617_v8 = vunpack.c.h.bf16 %v595_v2  ;;  %v1950_v2 = vld [vmem:[#allocation9] sm:$0xf]  ;;  %1131 = vmatpush.bf16.msrb.mxu0 %v1963_v0  ;;  %1144 = vmatpush.bf16.msrb.mxu1 %v2027_v1 }
 0x15f   :  { %v620_v9 = vadd.f32 %v618_v5, %v616_v7  ;;  %v621_v10 = vadd.f32 %v619_v6, %v617_v8  ;;  %v1951_v5 = vor.u32 %v2347_v3, %v1950_v2  ;;  %v2363_v6 = vld [vmem:[#allocation9 + $0x84] sm:$0xf0]  ;;  %v2346_v7 = vld [vmem:[#allocation9 + $0x4] sm:$0xf]  ;;  %v1952_v8 = vld [vmem:[#allocation9 + $0x8] sm:$0xf0] }
 0x160   :  { %v554_v11 = vpop.f32.mrf.mxu2  ;;  %v567_v12 = vpop.f32.mrf.mxu3 }
 0x161   :  { %v625_v13 = vmax.f32 %v620_v9, 0.0  ;;  %v626_v14 = vmax.f32 %v621_v10, 0.0  ;;  %v2015_v9 = vor.u32 %v2363_v6, %v2014_v4  ;;  %v1955_v10 = vor.u32 %v2346_v7, %v1952_v8  ;;  %v2362_v11 = vld [vmem:[#allocation9 + $0x84] sm:$0xf]  ;;  %v2016_v12 = vld [vmem:[#allocation9 + $0x88] sm:$0xf0]  ;;  %1106 = vmatpush.bf16.msra.mxu2 %v1951_v5 }
 0x163   :  { %v627_v15 = vpack.c.bf16 %v625_v13, %v625_v13  ;;  %v628_v16 = vpack.c.bf16 %v626_v14, %v626_v14  ;;  %v876_v13 = vperm.slane %v874_v63, 0  ;;  %v877_v14 = vperm.slane %v874_v63, 1  ;;  %1119 = vmatpush.bf16.msra.mxu3 %v2015_v9  ;;  %1132 = vmatpush.bf16.msrb.mxu0 %v1955_v10 }
 0x165   :  { %829 = vmatmul.bf16.vlgmr.msrb.gmra.mxu2 %v627_v15  ;;  %842 = vmatmul.bf16.vlgmr.msrb.gmra.mxu3 %v628_v16  ;;  %v880_v19 = vpack.c.bf16 %v877_v14, %v876_v13 }
 0x166   :  { %855 = vmatmul.bf16.vlgmr.msra.gmra.mxu0 %v627_v15  ;;  %868 = vmatmul.bf16.vlgmr.msra.gmra.mxu1 %v628_v16  ;;  %v2019_v15 = vor.u32 %v2362_v11, %v2016_v12  ;;  %v2134_v16 = vld [vmem:[#allocation12 + $0x70] sm:$0xf] }
 0x167   :  { %v2135_v20 = vor.u32 %v2393_v17, %v2134_v16  ;;  %1390 = vmatpush.bf16.msrb.mxu3 %v2199_v24  ;;  %1403 = vmatpush.bf16.msra.mxu0 %v2139_v25  ;;  %v882_v38 = vunpack.c.l.b16 %v880_v19  ;;  %v883_v39 = vunpack.c.h.b16 %v880_v19  ;;  %v2387_v19 = vld [vmem:[#allocation12 + $0x44] sm:$0xf0]  ;;  %v2112_v24 = vld [vmem:[#allocation12 + $0x48] sm:$0xf0] }
 0x168   :  { %1145 = vmatpush.bf16.msrb.mxu1 %v2019_v15  ;;  %v2111_v21 = vor.u32 %v2387_v19, %v2110_v18  ;;  %v2115_v26 = vor.u32 %v2386_v23, %v2112_v24  ;;  %v2425_v18 = vld [vmem:[#allocation15 + $0x78] sm:$0xff]  ;;  %v2415_v24 = vld [vmem:[#allocation15 + $0x28] sm:$0xff] }
 0x169   :  { %1377 = vmatpush.bf16.msrb.mxu2 %v2135_v20  ;;  %v884_v54 = vpack.c.b16 %v882_v38, %v882_v38  ;;  %v885_v55 = vpack.c.b16 %v883_v39, %v883_v39  ;;  %v2174_v20 = vld [vmem:[#allocation12 + $0xc0] sm:$0xf]  ;;  %v2107_v38 = vor.u32 %v2384_v35, %v2104_v36  ;;  %v2400_v39 = vld [vmem:[#allocation12 + $0xb4] sm:$0xf] }
 0x16a   :  { %v2175_v25 = vor.u32 %v2403_v22, %v2174_v20  ;;  %v2416_v20 = vld [vmem:[#allocation15 + $0x30] sm:$0xff] }
 0x16b   :  { %1391 = vmatpush.bf16.msrb.mxu3 %v2191_v34  ;;  %1404 = vmatpush.bf16.msra.mxu0 %v2131_v40  ;;  %v887_v59 = vpack.i.b16 %v884_v54, %v884_v54  ;;  %v891_v60 = vpack.i.b16 %v885_v55, %v885_v55  ;;  %v2401_v34 = vld [vmem:[#allocation12 + $0xb4] sm:$0xf0]  ;;  %v2168_v40 = vld [vmem:[#allocation12 + $0xb8] sm:$0xf0]  ;;  %v2086_v54 = vld [vmem:[#allocation12 + $0x10] sm:$0xf] }
 0x16c   :  { %1416 = vmatpush.bf16.msra.mxu1 %v2203_v29  ;;  %v2179_v29 = vor.u32 %v2402_v27, %v2176_v28  ;;  %v2167_v37 = vor.u32 %v2401_v34, %v2166_v32  ;;  %v2171_v41 = vor.u32 %v2400_v39, %v2168_v40  ;;  %v2381_v55 = vld [vmem:[#allocation12 + $0x14] sm:$0xf0] }
 0x16d   :  { %1378 = vmatpush.bf16.msrb.mxu2 %v2127_v33  ;;  %v889_v61 = vperm.slane %v887_v59, 0  ;;  %v893_v62 = vperm.slane %v891_v60, 0  ;;  %v2103_v33 = vor.u32 %v2385_v31, %v2102_v30  ;;  %v2380_v59 = vld [vmem:[#allocation12 + $0x14] sm:$0xf] }
 0x16f   :  { %1392 = vmatpush.bf16.msrb.mxu3 %v2183_v52  ;;  %1405 = vmatpush.bf16.msra.mxu0 %v2123_v53  ;;  %v896_v4 = vunpack.c.l.bf16 %v889_v61  ;;  %v897_v5 = vunpack.c.l.bf16 %v893_v62  ;;  %v2160_v52 = vld [vmem:[#allocation12 + $0xa8] sm:$0xf0]  ;;  %v2088_v61 = vld [vmem:[#allocation12 + $0x18] sm:$0xf0]  ;;  %v2396_v62 = vld [vmem:[#allocation12 + $0x94] sm:$0xf] }
 0x170   :  { %1417 = vmatpush.bf16.msra.mxu1 %v2195_v44  ;;  %v2158_v44 = vld [vmem:[#allocation12 + $0xa0] sm:$0xf]  ;;  %v2163_v53 = vor.u32 %v2398_v51, %v2160_v52 }
 0x171   :  { %1379 = vmatpush.bf16.msrb.mxu2 %v2119_v48  ;;  %v2096_v48 = vld [vmem:[#allocation12 + $0x28] sm:$0xf0]  ;;  %v2159_v49 = vor.u32 %v2399_v46, %v2158_v44 }
 0x172   :  { %v2099_v50 = vor.u32 %v2382_v47, %v2096_v48 }
 0x173   :  { %1393 = vmatpush.bf16.msrb.mxu3 %v2175_v25  ;;  %1406 = vmatpush.bf16.msra.mxu0 %v2115_v26  ;;  %v2423_v25 = vld [vmem:[#allocation15 + $0x68] sm:$0xff] }
 0x174   :  { %1418 = vmatpush.bf16.msra.mxu1 %v2187_v56  ;;  %v2150_v56 = vld [vmem:[#allocation12 + $0x90] sm:$0xf] }
 0x175   :  { %1380 = vmatpush.bf16.msrb.mxu2 %v2111_v21  ;;  %v2424_v21 = vld [vmem:[#allocation15 + $0x70] sm:$0xff] }
 0x177   :  { %1394 = vmatpush.bf16.msrb.mxu3 %v2167_v37  ;;  %1407 = vmatpush.bf16.msra.mxu0 %v2107_v38 }
 0x178   :  { %1419 = vmatpush.bf16.msra.mxu1 %v2179_v29 }
 0x179   :  { %1381 = vmatpush.bf16.msrb.mxu2 %v2103_v33 }
 0x17b   :  { %1395 = vmatpush.bf16.msrb.mxu3 %v2159_v49  ;;  %1408 = vmatpush.bf16.msra.mxu0 %v2099_v50 }
 0x17c   :  { %1420 = vmatpush.bf16.msra.mxu1 %v2171_v41 }
 0x17d   :  { %1382 = vmatpush.bf16.msrb.mxu2 %v2095_v45 }
 0x180   :  { %1421 = vmatpush.bf16.msra.mxu1 %v2163_v53  ;;  %v2414_v53 = vld [vmem:[#allocation15 + $0x20] sm:$0xff] }
 0x1e3   :  { %v856_v57 = vpop.f32.mrf.mxu0  ;;  %v869_v58 = vpop.f32.mrf.mxu1 }
 0x1e4   :  { %v870_v1 = vadd.f32 %v869_v58, %v856_v57  ;;  %v2087_v57 = vor.u32 %v2381_v55, %v2086_v54  ;;  %v2397_v58 = vld [vmem:[#allocation12 + $0x94] sm:$0xf0]  ;;  %v2422_v54 = vld [vmem:[#allocation15 + $0x60] sm:$0xff] }
 0x1e5   :  { %v2151_v60 = vor.u32 %v2397_v58, %v2150_v56  ;;  %v2413_v55 = vld [vmem:[#allocation15 + $0x18] sm:$0xff]  ;;  %v2420_v58 = vld [vmem:[#allocation15 + $0x50] sm:$0xff] }
 0x1e6   :  { %1383 = vmatpush.bf16.msrb.mxu2 %v2087_v57  ;;  %v2421_v56 = vld [vmem:[#allocation15 + $0x58] sm:$0xff]  ;;  %v2412_v57 = vld [vmem:[#allocation15 + $0x10] sm:$0xff] }
 0x1e7   :  { %1396 = vmatpush.bf16.msrb.mxu3 %v2151_v60  ;;  %v2419_v60 = vld [vmem:[#allocation15 + $0x48] sm:$0xff] }
 0x1e8   :  { %v830_v63 = vpop.f32.mrf.mxu2  ;;  %v843_v0 = vpop.f32.mrf.mxu3 }
 0x1e9   :  { %v844_v2 = vadd.f32 %v843_v0, %v830_v63  ;;  %v2152_v63 = vld [vmem:[#allocation12 + $0x98] sm:$0xf0] }
 0x1ea   :  { %v1152_v0 = vld [vmem:[#allocation10] sm:$0x3] }
 0x1eb   :  { %v873_v3 = vpack.c.bf16 %v870_v1, %v844_v2  ;;  %v858_v6 = vpop.f32.mrf.mxu0  ;;  %v871_v7 = vpop.f32.mrf.mxu1  ;;  %v2091_v1 = vor.u32 %v2380_v59, %v2088_v61  ;;  %v2155_v2 = vor.u32 %v2396_v62, %v2152_v63  ;;  %v2411_v59 = vld [vmem:[#allocation15 + $0x8] sm:$0xff]  ;;  %v1430_v61 = vld [vmem:[#allocation13] sm:$0x3]  ;;  %v2410_v62 = vld [vmem:[#allocation15] sm:$0xff] }
 0x1ec   :  { %v2395_v7 = vld [vmem:[#allocation12 + $0x84] sm:$0xf0] }
 0x1ed   :  { %v894_v8 = vunpack.c.l.bf16 %v873_v3  ;;  %v895_v9 = vunpack.c.h.bf16 %v873_v3  ;;  %v2078_v3 = vld [vmem:[#allocation12] sm:$0xf]  ;;  %1409 = vmatpush.bf16.msra.mxu0 %v2091_v1  ;;  %1422 = vmatpush.bf16.msra.mxu1 %v2155_v2  ;;  %v1433_v1 = vperm.slane %v1430_v61, 1 }
 0x1ee   :  { %v2418_v63 = vld [vmem:[#allocation15 + $0x40] sm:$0xff] }
 0x1ef   :  { %v898_v10 = vadd.f32 %v896_v4, %v894_v8  ;;  %v899_v11 = vadd.f32 %v897_v5, %v895_v9  ;;  %v2379_v4 = vld [vmem:[#allocation12 + $0x4] sm:$0xf0]  ;;  %v2142_v5 = vld [vmem:[#allocation12 + $0x80] sm:$0xf]  ;;  %v2378_v8 = vld [vmem:[#allocation12 + $0x4] sm:$0xf] }
 0x1f0   :  { %v832_v12 = vpop.f32.mrf.mxu2  ;;  %v845_v13 = vpop.f32.mrf.mxu3  ;;  %v2079_v6 = vor.u32 %v2379_v4, %v2078_v3  ;;  %v2080_v9 = vld [vmem:[#allocation12 + $0x8] sm:$0xf0] }
 0x1f1   :  { %v903_v14 = vmax.f32 %v898_v10, 0.0  ;;  %v904_v15 = vmax.f32 %v899_v11, 0.0  ;;  %v2143_v10 = vor.u32 %v2395_v7, %v2142_v5  ;;  %v2083_v11 = vor.u32 %v2378_v8, %v2080_v9  ;;  %v2394_v12 = vld [vmem:[#allocation12 + $0x84] sm:$0xf]  ;;  %v2144_v13 = vld [vmem:[#allocation12 + $0x88] sm:$0xf0] }
 0x1f2   :  { %1384 = vmatpush.bf16.msrb.mxu2 %v2079_v6 }
 0x1f3   :  { %v905_v16 = vpack.c.bf16 %v903_v14, %v903_v14  ;;  %v906_v17 = vpack.c.bf16 %v904_v15, %v904_v15  ;;  %v1154_v14 = vperm.slane %v1152_v0, 0  ;;  %v1155_v15 = vperm.slane %v1152_v0, 1  ;;  %1397 = vmatpush.bf16.msrb.mxu3 %v2143_v10  ;;  %1410 = vmatpush.bf16.msra.mxu0 %v2083_v11 }
 0x1f4   :  { %v1432_v0 = vperm.slane %v1430_v61, 0 }
 0x1f5   :  { %1107 = vmatmul.bf16.vlgmr.msra.gmra.mxu2 %v905_v16  ;;  %1120 = vmatmul.bf16.vlgmr.msra.gmra.mxu3 %v906_v17  ;;  %v1158_v19 = vpack.c.bf16 %v1155_v15, %v1154_v14 }
 0x1f6   :  { %1133 = vmatmul.bf16.vlgmr.msrb.gmra.mxu0 %v905_v16  ;;  %1146 = vmatmul.bf16.vlgmr.msrb.gmra.mxu1 %v906_v17  ;;  %v2147_v16 = vor.u32 %v2394_v12, %v2144_v13  ;;  %v2417_v17 = vld [vmem:[#allocation15 + $0x38] sm:$0xff]  ;;  %v1436_v2 = vpack.c.bf16 %v1433_v1, %v1432_v0 }
 0x1f7   :  { %1595 = vmatpush.bf16.msra.mxu2 %v2417_v17  ;;  %1608 = vmatpush.bf16.msra.mxu3 %v2425_v18  ;;  %v1160_v22 = vunpack.c.l.b16 %v1158_v19  ;;  %v1161_v23 = vunpack.c.h.b16 %v1158_v19 }
 0x1f8   :  { %1423 = vmatpush.bf16.msra.mxu1 %v2147_v16  ;;  %v1438_v3 = vunpack.c.l.b16 %v1436_v2  ;;  %v1439_v4 = vunpack.c.h.b16 %v1436_v2 }
 0x1f9   :  { %v1162_v26 = vpack.c.b16 %v1160_v22, %v1160_v22  ;;  %v1163_v27 = vpack.c.b16 %v1161_v23, %v1161_v23 }
 0x1fa   :  { %v1440_v5 = vpack.c.b16 %v1438_v3, %v1438_v3  ;;  %v1441_v6 = vpack.c.b16 %v1439_v4, %v1439_v4 }
 0x1fb   :  { %1596 = vmatpush.bf16.msra.mxu2 %v2416_v20  ;;  %1609 = vmatpush.bf16.msra.mxu3 %v2424_v21  ;;  %v1165_v30 = vpack.i.b16 %v1162_v26, %v1162_v26  ;;  %v1169_v31 = vpack.i.b16 %v1163_v27, %v1163_v27 }
 0x1fc   :  { %v1443_v9 = vpack.i.b16 %v1440_v5, %v1440_v5  ;;  %v1447_v10 = vpack.i.b16 %v1441_v6, %v1441_v6 }
 0x1fd   :  { %v1167_v32 = vperm.slane %v1165_v30, 0  ;;  %v1171_v33 = vperm.slane %v1169_v31, 0 }
 0x1fe   :  { %v1445_v11 = vperm.slane %v1443_v9, 0  ;;  %v1449_v12 = vperm.slane %v1447_v10, 0 }
 0x1ff   :  { %1597 = vmatpush.bf16.msra.mxu2 %v2415_v24  ;;  %1610 = vmatpush.bf16.msra.mxu3 %v2423_v25  ;;  %v1174_v39 = vunpack.c.l.bf16 %v1167_v32  ;;  %v1175_v40 = vunpack.c.l.bf16 %v1171_v33  ;;  %v2441_v32 = vld [vmem:[#allocation16] ss:$0 sm:$0xff] }
 0x200   :  { %v1452_v18 = vunpack.c.l.bf16 %v1445_v11  ;;  %v1453_v19 = vunpack.c.l.bf16 %v1449_v12 }
 0x203   :  { %1598 = vmatpush.bf16.msra.mxu2 %v2414_v53  ;;  %1611 = vmatpush.bf16.msra.mxu3 %v2422_v54 }
 0x207   :  { %1599 = vmatpush.bf16.msra.mxu2 %v2413_v55  ;;  %1612 = vmatpush.bf16.msra.mxu3 %v2421_v56 }
 0x20b   :  { %1600 = vmatpush.bf16.msra.mxu2 %v2412_v57  ;;  %1613 = vmatpush.bf16.msra.mxu3 %v2420_v58 }
 0x20f   :  { %1601 = vmatpush.bf16.msra.mxu2 %v2411_v59  ;;  %1614 = vmatpush.bf16.msra.mxu3 %v2419_v60 }
 0x213   :  { %1602 = vmatpush.bf16.msra.mxu2 %v2410_v62  ;;  %1615 = vmatpush.bf16.msra.mxu3 %v2418_v63 }
 0x273   :  { %v1134_v28 = vpop.f32.mrf.mxu0  ;;  %v1147_v29 = vpop.f32.mrf.mxu1 }
 0x274   :  { %v1148_v36 = vadd.f32 %v1147_v29, %v1134_v28 }
 0x278   :  { %v1108_v34 = vpop.f32.mrf.mxu2  ;;  %v1121_v35 = vpop.f32.mrf.mxu3 }
 0x279   :  { %v1122_v37 = vadd.f32 %v1121_v35, %v1108_v34 }
 0x27b   :  { %v1151_v38 = vpack.c.bf16 %v1148_v36, %v1122_v37  ;;  %v1136_v41 = vpop.f32.mrf.mxu0  ;;  %v1149_v42 = vpop.f32.mrf.mxu1 }
 0x27d   :  { %v1172_v43 = vunpack.c.l.bf16 %v1151_v38  ;;  %v1173_v44 = vunpack.c.h.bf16 %v1151_v38 }
 0x27f   :  { %v1176_v45 = vadd.f32 %v1174_v39, %v1172_v43  ;;  %v1177_v46 = vadd.f32 %v1175_v40, %v1173_v44 }
 0x280   :  { %v1110_v47 = vpop.f32.mrf.mxu2  ;;  %v1123_v48 = vpop.f32.mrf.mxu3 }
 0x281   :  { %v1181_v49 = vmax.f32 %v1176_v45, 0.0  ;;  %v1182_v50 = vmax.f32 %v1177_v46, 0.0 }
 0x283   :  { %v1183_v51 = vpack.c.bf16 %v1181_v49, %v1181_v49  ;;  %v1184_v52 = vpack.c.bf16 %v1182_v50, %v1182_v50 }
 0x285   :  { %1385 = vmatmul.bf16.vlgmr.msrb.gmra.mxu2 %v1183_v51  ;;  %1398 = vmatmul.bf16.vlgmr.msrb.gmra.mxu3 %v1184_v52 }
 0x286   :  { %1411 = vmatmul.bf16.vlgmr.msra.gmra.mxu0 %v1183_v51  ;;  %1424 = vmatmul.bf16.vlgmr.msra.gmra.mxu1 %v1184_v52 }
 0x303   :  { %v1412_v7 = vpop.f32.mrf.mxu0  ;;  %v1425_v8 = vpop.f32.mrf.mxu1 }
 0x304   :  { %v1426_v15 = vadd.f32 %v1425_v8, %v1412_v7 }
 0x308   :  { %v1386_v13 = vpop.f32.mrf.mxu2  ;;  %v1399_v14 = vpop.f32.mrf.mxu3 }
 0x309   :  { %v1400_v16 = vadd.f32 %v1399_v14, %v1386_v13 }
 0x30b   :  { %v1429_v17 = vpack.c.bf16 %v1426_v15, %v1400_v16  ;;  %v1414_v20 = vpop.f32.mrf.mxu0  ;;  %v1427_v21 = vpop.f32.mrf.mxu1 }
 0x30d   :  { %v1450_v22 = vunpack.c.l.bf16 %v1429_v17  ;;  %v1451_v23 = vunpack.c.h.bf16 %v1429_v17 }
 0x30f   :  { %v1454_v24 = vadd.f32 %v1452_v18, %v1450_v22  ;;  %v1455_v25 = vadd.f32 %v1453_v19, %v1451_v23 }
 0x310   :  { %v1388_v26 = vpop.f32.mrf.mxu2  ;;  %v1401_v27 = vpop.f32.mrf.mxu3 }
 0x311   :  { %v1459_v28 = vmax.f32 %v1454_v24, 0.0  ;;  %v1460_v29 = vmax.f32 %v1455_v25, 0.0 }
 0x313   :  { %v1461_v30 = vpack.c.bf16 %v1459_v28, %v1459_v28  ;;  %v1462_v31 = vpack.c.bf16 %v1460_v29, %v1460_v29 }
 0x315   :  { %1603 = vmatmul.bf16.vlgmr.msra.gmra.mxu2 %v1461_v30  ;;  %1616 = vmatmul.bf16.vlgmr.msra.gmra.mxu3 %v1462_v31 }
 0x398   :  { %v1604_v33 = vpop.f32.mrf.mxu2  ;;  %v1617_v34 = vpop.f32.mrf.mxu3 }
 0x399   :  { %v1605_v35 = vadd.f32 %v2441_v32, %v1604_v33 }
 0x39b   :  { %v1618_v36 = vadd.f32 %v1617_v34, %v1605_v35 }
 0x39d   :  { %v1621_v37 = vpack.c.bf16 %v1618_v36, %v1618_v36 }
 0x39f   :  { %1623 = vst.msk [vmem:[%s2849_s13] sm:$0xf] %vm1622_vm3, %v1621_v37 }
 0x3a0   :  { %v1606_v38 = vpop.f32.mrf.mxu2  ;;  %v1619_v39 = vpop.f32.mrf.mxu3 }
 0x3a1   :  { %1628 = vsyncpa [#allocation3], 1 }
 0x3a2   :  { %1629 = vsyncpa [#allocation5], 1 }
 0x3a3   :  { %1630 = vsyncpa [#allocation8], 1 }
 0x3a4   :  { %1631 = vsyncpa [#allocation11], 1 }
 0x3a5   :  { %1632 = vsyncpa [#allocation14], 1 }
 0x3a6   :  { %1633 = vsyncpa [#allocation17], 1 }

</bundles_post_ra>
